<compile_context>
chip_gen: v6e
topology: v6e:2x2x1
jax: 0.10.0
libtpu: 0.0.40
codegen_flags: <defaults>
</compile_context>

<pallas_src>
import math
import jax
import jax.numpy as jnp
from jax import lax
from jax.experimental import pallas as pl
from jax.experimental.pallas import tpu as pltpu

# ---- model hyper-params (small, consistent with the module) ----
B = 2          # batch
L = 8          # seq len
IN_DIM = 16    # in_dim
HID = 32       # hid_dim (d_model)
OUT_DIM = 32   # out_dim
NHEAD = 4
HEAD_DIM = HID // NHEAD
N_LAYERS = 2
FF_DIM = 2 * HID
MAX_LEN = 300
EPS = 1e-5         # nn.LayerNorm default eps
OUT_PAD = 128      # lane-dense output slab width
NEG = -1e30        # finite mask bias (adj always has self-loops -> no all-masked rows)

# ---- packed matrix slab layout (row offsets; all multiples of 8) ----
R_W0 = 0                               # [IN_DIM, HID]
M_LAYER0 = R_W0 + IN_DIM               # per-layer block start
MO_WQ, MO_WK, MO_WV, MO_WO = 0, HID, 2 * HID, 3 * HID
MO_FF1 = 4 * HID                       # [HID, FF_DIM]
MO_FF2 = 4 * HID + HID                 # [FF_DIM, HID]
M_LSTRIDE = 4 * HID + HID + FF_DIM     # 224 rows / layer
R_FC1 = M_LAYER0 + N_LAYERS * M_LSTRIDE          # [HID, OUT_DIM]
R_FC2 = R_FC1 + HID                              # [HID, OUT_DIM]
MAT_ROWS = R_FC2 + HID                           # 528
MAT_W = max(HID, FF_DIM, OUT_DIM)                # 64

# ---- packed vector slab layout (one vector per row) ----
V_B0 = 0
V_LAYER0 = 1
VO_BQ, VO_BK, VO_BV, VO_BO = 0, 1, 2, 3
VO_FF1B, VO_FF2B = 4, 5
VO_LN1G, VO_LN1B, VO_LN2G, VO_LN2B = 6, 7, 8, 9
V_LSTRIDE = 10
V_FC1B = V_LAYER0 + N_LAYERS * V_LSTRIDE
V_FC2B = V_FC1B + 1
V_INV = V_FC2B + 1
V_HM = V_INV + 1                       # NHEAD head-lane-mask rows
VEC_ROWS = 32
VEC_W = 64


def _layernorm(x, gamma, beta):
    mu = jnp.mean(x, axis=-1, keepdims=True)
    var = jnp.mean((x - mu) ** 2, axis=-1, keepdims=True)
    return (x - mu) * lax.rsqrt(var + EPS) * gamma + beta


# ------------------------------------------------------------------ fused kernel

def fused_transformer_kernel(x_ref, pe_ref, bias_ref, mat_ref, vec_ref, idx_ref,
                             out_ref, h_scr):
    f32 = jnp.float32

    def vrow(r, w=HID):
        return vec_ref[r:r + 1, :w]                 # [1, w]

    def mat(r, rows, w):
        return mat_ref[r:r + rows, :w]              # [rows, w]

    # ---- fc0 + positional encoding (PE rows pre-gathered in wrapper) ----
    h = jnp.dot(x_ref[...], mat(R_W0, IN_DIM, HID),
                preferred_element_type=f32) + vrow(V_B0)
    h = h + pe_ref[...]                             # [B*L, HID]

    bias = bias_ref[...]                            # [B*L, B*L]; cross-batch = NEG
    hmask = [vrow(V_HM + z) for z in range(NHEAD)]  # constant head lane masks

    for li in range(N_LAYERS):                      # fully unrolled (N_LAYERS = 2)
        mb = M_LAYER0 + li * M_LSTRIDE
        vb = V_LAYER0 + li * V_LSTRIDE

        # q projection already carries the 1/sqrt(head_dim) scale (folded on host)
        q = jnp.dot(h, mat(mb + MO_WQ, HID, HID), preferred_element_type=f32) + vrow(vb + VO_BQ)
        k = jnp.dot(h, mat(mb + MO_WK, HID, HID), preferred_element_type=f32) + vrow(vb + VO_BK)
        v = jnp.dot(h, mat(mb + MO_WV, HID, HID), preferred_element_type=f32) + vrow(vb + VO_BV)

        ctx = jnp.zeros((B * L, HID), f32)
        for z in range(NHEAD):
            # head-lane-masked scores; no lane slicing / stacking / relayout
            s = lax.dot_general(q * hmask[z], k, (((1,), (1,)), ((), ())),
                                preferred_element_type=f32) + bias     # [B*L, B*L]
            s = s - jnp.max(s, axis=-1, keepdims=True)
            p = jnp.exp(s)
            p = p / jnp.sum(p, axis=-1, keepdims=True)                 # exact softmax
            ctx = ctx + jnp.dot(p, v * hmask[z], preferred_element_type=f32)

        attn = jnp.dot(ctx, mat(mb + MO_WO, HID, HID),
                       preferred_element_type=f32) + vrow(vb + VO_BO)
        h = _layernorm(h + attn, vrow(vb + VO_LN1G), vrow(vb + VO_LN1B))

        ff = jnp.dot(h, mat(mb + MO_FF1, HID, FF_DIM),
                     preferred_element_type=f32) + vrow(vb + VO_FF1B, FF_DIM)
        ff = jnp.maximum(ff, 0.0)
        ff = jnp.dot(ff, mat(mb + MO_FF2, FF_DIM, HID),
                     preferred_element_type=f32) + vrow(vb + VO_FF2B)
        h = _layernorm(h + ff, vrow(vb + VO_LN2G), vrow(vb + VO_LN2B))

    # hidden states to scratch for the dynamic local row-select
    h_scr[...] = h

    # ---- global mean-pool per batch (sublane mean, no one-hot matmul) ----
    glob_rows = [jnp.mean(h[b * L:(b + 1) * L, :], axis=0, keepdims=True)
                 for b in range(B)]
    emb_global = jnp.concatenate(glob_rows, axis=0)                      # [B, HID]
    glob = jnp.dot(emb_global, mat(R_FC2, HID, OUT_DIM),
                   preferred_element_type=f32) + vrow(V_FC2B, OUT_DIM)

    # ---- local row-select: scalar-indexed dynamic read, idx lives in SMEM ----
    inv = vrow(V_INV)
    loc_rows = []
    for b in range(B):
        ib = idx_ref[b]                                                  # scalar int32
        safe = jnp.maximum(ib, 0)
        row = h_scr[pl.ds(b * L + safe, 1), :]                           # [1, HID]
        valid = (ib >= 0).astype(f32)
        loc_rows.append(row * valid + inv * (1.0 - valid))               # invalid_node path
    emb_local = jnp.concatenate(loc_rows, axis=0)                        # [B, HID]
    loc = jnp.dot(emb_local, mat(R_FC1, HID, OUT_DIM),
                  preferred_element_type=f32) + vrow(V_FC1B, OUT_DIM)

    # lane-dense (B, 128) output slab: [ global | local | zero pad ]
    out_ref[...] = jnp.zeros((B, OUT_PAD), f32)
    out_ref[:, :OUT_DIM] = glob
    out_ref[:, OUT_DIM:2 * OUT_DIM] = loc


# ------------------------------------------------------------------ wrapper

@jax.jit
def transformer_forward(packed, x, adj_mat, idx, order):
    x2 = x.reshape(B * L, IN_DIM).astype(jnp.float32)

    # PE gather done here (16 rows) instead of a one-hot matmul over the 300-row table.
    pe_rows = packed["pe_table"][order.reshape(-1).astype(jnp.int32)]   # [B*L, HID]

    # Full [B*L, B*L] attention bias: adjacency mask on the block diagonal,
    # cross-batch entries disabled (finite NEG: adj has self-loops, so no NaN path).
    neg = jnp.float32(NEG)
    bias_blocks = jnp.where(adj_mat == 0, neg, jnp.float32(0.0))
    bias_full = jnp.full((B * L, B * L), neg, jnp.float32)
    for b in range(B):
        bias_full = bias_full.at[b * L:(b + 1) * L, b * L:(b + 1) * L].set(bias_blocks[b])

    idx_i32 = idx.reshape(B).astype(jnp.int32)

    out = pl.pallas_call(
        fused_transformer_kernel,
        out_shape=jax.ShapeDtypeStruct((B, OUT_PAD), jnp.float32),
        in_specs=[
            pl.BlockSpec(memory_space=pltpu.MemorySpace.VMEM),   # x2
            pl.BlockSpec(memory_space=pltpu.MemorySpace.VMEM),   # pe_rows
            pl.BlockSpec(memory_space=pltpu.MemorySpace.VMEM),   # attention bias
            pl.BlockSpec(memory_space=pltpu.MemorySpace.VMEM),   # matrix slab
            pl.BlockSpec(memory_space=pltpu.MemorySpace.VMEM),   # vector slab
            pl.BlockSpec(memory_space=pltpu.MemorySpace.SMEM),   # idx (scalars)
        ],
        out_specs=pl.BlockSpec(memory_space=pltpu.MemorySpace.VMEM),
        scratch_shapes=[pltpu.VMEM((B * L, HID), jnp.float32)],
    )(x2, pe_rows, bias_full, packed["mat"], packed["vec"], idx_i32)

    return out[:, :OUT_DIM], out[:, OUT_DIM:2 * OUT_DIM]


# ------------------------------------------------------------------ parameters

def make_params(key):
    def normal(k, shape, scale=0.1):
        return scale * jax.random.normal(k, shape, dtype=jnp.float32)

    keys = jax.random.split(key, 12)
    p = {}
    p["w0"] = normal(keys[0], (IN_DIM, HID))
    p["b0"] = normal(keys[1], (HID,))
    p["fc1_w"] = normal(keys[2], (HID, OUT_DIM))
    p["fc1_b"] = normal(keys[3], (OUT_DIM,))
    p["fc2_w"] = normal(keys[4], (HID, OUT_DIM))
    p["fc2_b"] = normal(keys[5], (OUT_DIM,))
    p["invalid_node"] = normal(keys[6], (HID,))

    # non-trainable sinusoidal positional encoding table [MAX_LEN, HID]
    pos = jnp.arange(MAX_LEN, dtype=jnp.float32)[:, None]
    div = jnp.exp(jnp.arange(0, HID, 2, dtype=jnp.float32) * (-math.log(10000.0) / HID))
    pe = jnp.zeros((MAX_LEN, HID), jnp.float32)
    pe = pe.at[:, 0::2].set(jnp.sin(pos * div))
    pe = pe.at[:, 1::2].set(jnp.cos(pos * div))
    p["pe_table"] = pe

    layers = []
    for li in range(N_LAYERS):
        lk = jax.random.split(keys[10 + li], 10)
        layers.append(dict(
            wq=normal(lk[0], (HID, HID)), bq=normal(lk[1], (HID,)),
            wk=normal(lk[2], (HID, HID)), bk=normal(lk[3], (HID,)),
            wv=normal(lk[4], (HID, HID)), bv=normal(lk[5], (HID,)),
            wo=normal(lk[6], (HID, HID)), bo=normal(lk[7], (HID,)),
            ff1_w=normal(lk[8], (HID, FF_DIM)), ff1_b=jnp.zeros((FF_DIM,), jnp.float32),
            ff2_w=normal(lk[9], (FF_DIM, HID)), ff2_b=jnp.zeros((HID,), jnp.float32),
            ln1_g=jnp.ones((HID,), jnp.float32), ln1_b=jnp.zeros((HID,), jnp.float32),
            ln2_g=jnp.ones((HID,), jnp.float32), ln2_b=jnp.zeros((HID,), jnp.float32),
        ))
    p["layers"] = layers
    return p


def pack_params(p):
    """Pack all weights into one matrix slab + one vector slab (2 DMAs total)."""
    scale = 1.0 / math.sqrt(HEAD_DIM)
    mat = jnp.zeros((MAT_ROWS, MAT_W), jnp.float32)
    vec = jnp.zeros((VEC_ROWS, VEC_W), jnp.float32)

    def put_m(slab, r, w):
        return slab.at[r:r + w.shape[0], :w.shape[1]].set(w)

    def put_v(slab, r, v):
        return slab.at[r, :v.shape[0]].set(v)

    mat = put_m(mat, R_W0, p["w0"])
    vec = put_v(vec, V_B0, p["b0"])
    for li, lp in enumerate(p["layers"]):
        mb = M_LAYER0 + li * M_LSTRIDE
        vb = V_LAYER0 + li * V_LSTRIDE
        mat = put_m(mat, mb + MO_WQ, lp["wq"] * scale)   # fold 1/sqrt(head_dim) into q
        mat = put_m(mat, mb + MO_WK, lp["wk"])
        mat = put_m(mat, mb + MO_WV, lp["wv"])
        mat = put_m(mat, mb + MO_WO, lp["wo"])
        mat = put_m(mat, mb + MO_FF1, lp["ff1_w"])
        mat = put_m(mat, mb + MO_FF2, lp["ff2_w"])
        vec = put_v(vec, vb + VO_BQ, lp["bq"] * scale)
        vec = put_v(vec, vb + VO_BK, lp["bk"])
        vec = put_v(vec, vb + VO_BV, lp["bv"])
        vec = put_v(vec, vb + VO_BO, lp["bo"])
        vec = put_v(vec, vb + VO_FF1B, lp["ff1_b"])
        vec = put_v(vec, vb + VO_FF2B, lp["ff2_b"])
        vec = put_v(vec, vb + VO_LN1G, lp["ln1_g"])
        vec = put_v(vec, vb + VO_LN1B, lp["ln1_b"])
        vec = put_v(vec, vb + VO_LN2G, lp["ln2_g"])
        vec = put_v(vec, vb + VO_LN2B, lp["ln2_b"])
    mat = put_m(mat, R_FC1, p["fc1_w"])
    mat = put_m(mat, R_FC2, p["fc2_w"])
    vec = put_v(vec, V_FC1B, p["fc1_b"])
    vec = put_v(vec, V_FC2B, p["fc2_b"])
    vec = put_v(vec, V_INV, p["invalid_node"])
    for z in range(NHEAD):
        hm = jnp.zeros((HID,), jnp.float32).at[z * HEAD_DIM:(z + 1) * HEAD_DIM].set(1.0)
        vec = put_v(vec, V_HM + z, hm)
    return {"mat": mat, "vec": vec, "pe_table": p["pe_table"]}


# ------------------------------------------------------------------ pure-JAX reference

def reference_forward(params, x, adj_mat, idx, order):
    scale = 1.0 / math.sqrt(HEAD_DIM)
    h = x.astype(jnp.float32) @ params["w0"] + params["b0"]
    h = h + params["pe_table"][order.reshape(-1)].reshape(B, L, HID)
    mask_bias = jnp.where(adj_mat == 0, jnp.float32(NEG), jnp.float32(0.0))   # [B, L, L]
    for lp in params["layers"]:
        q = h @ lp["wq"] + lp["bq"]
        k = h @ lp["wk"] + lp["bk"]
        v = h @ lp["wv"] + lp["bv"]
        heads = []
        for z in range(NHEAD):
            sl = slice(z * HEAD_DIM, (z + 1) * HEAD_DIM)
            s = jnp.einsum('bqd,bkd->bqk', q[..., sl], k[..., sl]) * scale + mask_bias
            heads.append(jnp.einsum('bqk,bkd->bqd', jax.nn.softmax(s, axis=-1), v[..., sl]))
        ctx = jnp.concatenate(heads, axis=-1)
        attn = ctx @ lp["wo"] + lp["bo"]
        h = _layernorm(h + attn, lp["ln1_g"], lp["ln1_b"])
        ff = jnp.maximum(h @ lp["ff1_w"] + lp["ff1_b"], 0.0)
        ff = ff @ lp["ff2_w"] + lp["ff2_b"]
        h = _layernorm(h + ff, lp["ln2_g"], lp["ln2_b"])
    safe_idx = jnp.where(idx < 0, 0, idx)
    emb_local = h[jnp.arange(B), safe_idx]
    emb_local = jnp.where((idx < 0)[:, None], params["invalid_node"][None, :], emb_local)
    emb_global = h.mean(axis=1)
    return (emb_global @ params["fc2_w"] + params["fc2_b"],
            emb_local @ params["fc1_w"] + params["fc1_b"])


# ------------------------------------------------------------------ main

if __name__ == "__main__":
    key = jax.random.PRNGKey(0)
    k_param, k_x, k_adj, k_order = jax.random.split(key, 4)

    params = make_params(k_param)
    packed = pack_params(params)

    x = jax.random.normal(k_x, (B, L, IN_DIM), dtype=jnp.float32)
    adj_mat = (jax.random.uniform(k_adj, (B, L, L)) > 0.4).astype(jnp.int32)
    adj_mat = jnp.maximum(adj_mat, jnp.eye(L, dtype=jnp.int32)[None])   # self-loops
    idx = jnp.array([3, -1], dtype=jnp.int32)                           # exercises invalid_node path
    order = jax.random.randint(k_order, (B, L), 0, L, dtype=jnp.int32)

    emb_global, emb_local = transformer_forward(packed, x, adj_mat, idx, order)
    jax.block_until_ready((emb_global, emb_local))

    assert emb_global.shape == (B, OUT_DIM) and emb_local.shape == (B, OUT_DIM)
    assert bool(jnp.all(jnp.isfinite(emb_global))) and bool(jnp.all(jnp.isfinite(emb_local)))

    ref_global, ref_local = reference_forward(params, x, adj_mat, idx, order)
    assert bool(jnp.allclose(emb_global, ref_global, rtol=5e-3, atol=5e-3))
    assert bool(jnp.allclose(emb_local, ref_local, rtol=5e-3, atol=5e-3))
    print("KERNEL_OK")
</pallas_src>

<mosaic_0001>
module attributes {stable_mosaic.version = 11 : i64} {
  func.func @fused_transformer_kernel(%arg0: memref<16x16xf32, #tpu.memory_space<vmem>>, %arg1: memref<16x32xf32, #tpu.memory_space<vmem>>, %arg2: memref<16x16xf32, #tpu.memory_space<vmem>>, %arg3: memref<528x64xf32, #tpu.memory_space<vmem>>, %arg4: memref<32x64xf32, #tpu.memory_space<vmem>>, %arg5: memref<2xi32, #tpu.memory_space<smem>>, %arg6: memref<2x128xf32, #tpu.memory_space<vmem>>, %arg7: memref<16x32xf32, #tpu.memory_space<vmem>>) attributes {dimension_semantics = [], scalar_prefetch = 0 : i64, scratch_operands = 1 : i64, tpu.core_type = #tpu.core_type<tc>} {
    %c0 = arith.constant 0 : index
    %c0_0 = arith.constant 0 : index
    %0 = vector.load %arg0[%c0, %c0_0] : memref<16x16xf32, #tpu.memory_space<vmem>>, vector<16x16xf32>
    %c0_1 = arith.constant 0 : index
    %c0_2 = arith.constant 0 : index
    %1 = vector.load %arg3[%c0_1, %c0_2] : memref<528x64xf32, #tpu.memory_space<vmem>>, vector<16x32xf32>
    %cst = arith.constant dense<0.000000e+00> : vector<16x32xf32>
    %2 = tpu.matmul %0, %1, %cst {dimension_numbers = #tpu.dot_dimension_numbers<[1], [0], [0], [1], [0, 0, 1, 1], [], []>} : vector<16x16xf32>, vector<16x32xf32>, vector<16x32xf32> -> vector<16x32xf32>
    %c0_3 = arith.constant 0 : index
    %c0_4 = arith.constant 0 : index
    %3 = vector.load %arg4[%c0_3, %c0_4] : memref<32x64xf32, #tpu.memory_space<vmem>>, vector<1x32xf32>
    %4 = vector.broadcast %3 : vector<1x32xf32> to vector<16x32xf32>
    %5 = arith.addf %2, %4 : vector<16x32xf32>
    %c0_5 = arith.constant 0 : index
    %c0_6 = arith.constant 0 : index
    %6 = vector.load %arg1[%c0_5, %c0_6] : memref<16x32xf32, #tpu.memory_space<vmem>>, vector<16x32xf32>
    %7 = arith.addf %5, %6 : vector<16x32xf32>
    %c0_7 = arith.constant 0 : index
    %c0_8 = arith.constant 0 : index
    %8 = vector.load %arg2[%c0_7, %c0_8] : memref<16x16xf32, #tpu.memory_space<vmem>>, vector<16x16xf32>
    %c24 = arith.constant 24 : index
    %c0_9 = arith.constant 0 : index
    %9 = vector.load %arg4[%c24, %c0_9] : memref<32x64xf32, #tpu.memory_space<vmem>>, vector<1x32xf32>
    %c25 = arith.constant 25 : index
    %c0_10 = arith.constant 0 : index
    %10 = vector.load %arg4[%c25, %c0_10] : memref<32x64xf32, #tpu.memory_space<vmem>>, vector<1x32xf32>
    %c26 = arith.constant 26 : index
    %c0_11 = arith.constant 0 : index
    %11 = vector.load %arg4[%c26, %c0_11] : memref<32x64xf32, #tpu.memory_space<vmem>>, vector<1x32xf32>
    %c27 = arith.constant 27 : index
    %c0_12 = arith.constant 0 : index
    %12 = vector.load %arg4[%c27, %c0_12] : memref<32x64xf32, #tpu.memory_space<vmem>>, vector<1x32xf32>
    %c16 = arith.constant 16 : index
    %c0_13 = arith.constant 0 : index
    %13 = vector.load %arg3[%c16, %c0_13] : memref<528x64xf32, #tpu.memory_space<vmem>>, vector<32x32xf32>
    %cst_14 = arith.constant dense<0.000000e+00> : vector<16x32xf32>
    %14 = tpu.matmul %7, %13, %cst_14 {dimension_numbers = #tpu.dot_dimension_numbers<[1], [0], [0], [1], [0, 0, 1, 1], [], []>} : vector<16x32xf32>, vector<32x32xf32>, vector<16x32xf32> -> vector<16x32xf32>
    %c1 = arith.constant 1 : index
    %c0_15 = arith.constant 0 : index
    %15 = vector.load %arg4[%c1, %c0_15] : memref<32x64xf32, #tpu.memory_space<vmem>>, vector<1x32xf32>
    %16 = vector.broadcast %15 : vector<1x32xf32> to vector<16x32xf32>
    %17 = arith.addf %14, %16 : vector<16x32xf32>
    %c48 = arith.constant 48 : index
    %c0_16 = arith.constant 0 : index
    %18 = vector.load %arg3[%c48, %c0_16] : memref<528x64xf32, #tpu.memory_space<vmem>>, vector<32x32xf32>
    %cst_17 = arith.constant dense<0.000000e+00> : vector<16x32xf32>
    %19 = tpu.matmul %7, %18, %cst_17 {dimension_numbers = #tpu.dot_dimension_numbers<[1], [0], [0], [1], [0, 0, 1, 1], [], []>} : vector<16x32xf32>, vector<32x32xf32>, vector<16x32xf32> -> vector<16x32xf32>
    %c2 = arith.constant 2 : index
    %c0_18 = arith.constant 0 : index
    %20 = vector.load %arg4[%c2, %c0_18] : memref<32x64xf32, #tpu.memory_space<vmem>>, vector<1x32xf32>
    %21 = vector.broadcast %20 : vector<1x32xf32> to vector<16x32xf32>
    %22 = arith.addf %19, %21 : vector<16x32xf32>
    %c80 = arith.constant 80 : index
    %c0_19 = arith.constant 0 : index
    %23 = vector.load %arg3[%c80, %c0_19] : memref<528x64xf32, #tpu.memory_space<vmem>>, vector<32x32xf32>
    %cst_20 = arith.constant dense<0.000000e+00> : vector<16x32xf32>
    %24 = tpu.matmul %7, %23, %cst_20 {dimension_numbers = #tpu.dot_dimension_numbers<[1], [0], [0], [1], [0, 0, 1, 1], [], []>} : vector<16x32xf32>, vector<32x32xf32>, vector<16x32xf32> -> vector<16x32xf32>
    %c3 = arith.constant 3 : index
    %c0_21 = arith.constant 0 : index
    %25 = vector.load %arg4[%c3, %c0_21] : memref<32x64xf32, #tpu.memory_space<vmem>>, vector<1x32xf32>
    %26 = vector.broadcast %25 : vector<1x32xf32> to vector<16x32xf32>
    %27 = arith.addf %24, %26 : vector<16x32xf32>
    %cst_22 = arith.constant 0.000000e+00 : f32
    %28 = vector.broadcast %cst_22 : f32 to vector<16x32xf32>
    %29 = vector.broadcast %9 : vector<1x32xf32> to vector<16x32xf32>
    %30 = arith.mulf %17, %29 : vector<16x32xf32>
    %cst_23 = arith.constant dense<0.000000e+00> : vector<16x16xf32>
    %31 = tpu.matmul %30, %22, %cst_23 {dimension_numbers = #tpu.dot_dimension_numbers<[1], [1], [0], [0], [0, 0, 1, 0], [], []>} : vector<16x32xf32>, vector<16x32xf32>, vector<16x16xf32> -> vector<16x16xf32>
    %32 = arith.addf %31, %8 : vector<16x16xf32>
    %cst_24 = arith.constant dense<0xFF800000> : vector<16xf32>
    %33 = vector.multi_reduction <maximumf>, %32, %cst_24 [1] : vector<16x16xf32> to vector<16xf32>
    %34 = vector.shape_cast %33 : vector<16xf32> to vector<16x1xf32>
    %35 = vector.broadcast %34 : vector<16x1xf32> to vector<16x16xf32>
    %36 = arith.subf %32, %35 : vector<16x16xf32>
    %37 = math.exp %36 : vector<16x16xf32>
    %cst_25 = arith.constant dense<0.000000e+00> : vector<16xf32>
    %38 = vector.multi_reduction <add>, %37, %cst_25 [1] : vector<16x16xf32> to vector<16xf32>
    %39 = vector.shape_cast %38 : vector<16xf32> to vector<16x1xf32>
    %40 = vector.broadcast %39 : vector<16x1xf32> to vector<16x16xf32>
    %41 = arith.divf %37, %40 : vector<16x16xf32>
    %42 = vector.broadcast %9 : vector<1x32xf32> to vector<16x32xf32>
    %43 = arith.mulf %27, %42 : vector<16x32xf32>
    %cst_26 = arith.constant dense<0.000000e+00> : vector<16x32xf32>
    %44 = tpu.matmul %41, %43, %cst_26 {dimension_numbers = #tpu.dot_dimension_numbers<[1], [0], [0], [1], [0, 0, 1, 1], [], []>} : vector<16x16xf32>, vector<16x32xf32>, vector<16x32xf32> -> vector<16x32xf32>
    %45 = arith.addf %28, %44 : vector<16x32xf32>
    %46 = vector.broadcast %10 : vector<1x32xf32> to vector<16x32xf32>
    %47 = arith.mulf %17, %46 : vector<16x32xf32>
    %cst_27 = arith.constant dense<0.000000e+00> : vector<16x16xf32>
    %48 = tpu.matmul %47, %22, %cst_27 {dimension_numbers = #tpu.dot_dimension_numbers<[1], [1], [0], [0], [0, 0, 1, 0], [], []>} : vector<16x32xf32>, vector<16x32xf32>, vector<16x16xf32> -> vector<16x16xf32>
    %49 = arith.addf %48, %8 : vector<16x16xf32>
    %cst_28 = arith.constant dense<0xFF800000> : vector<16xf32>
    %50 = vector.multi_reduction <maximumf>, %49, %cst_28 [1] : vector<16x16xf32> to vector<16xf32>
    %51 = vector.shape_cast %50 : vector<16xf32> to vector<16x1xf32>
    %52 = vector.broadcast %51 : vector<16x1xf32> to vector<16x16xf32>
    %53 = arith.subf %49, %52 : vector<16x16xf32>
    %54 = math.exp %53 : vector<16x16xf32>
    %cst_29 = arith.constant dense<0.000000e+00> : vector<16xf32>
    %55 = vector.multi_reduction <add>, %54, %cst_29 [1] : vector<16x16xf32> to vector<16xf32>
    %56 = vector.shape_cast %55 : vector<16xf32> to vector<16x1xf32>
    %57 = vector.broadcast %56 : vector<16x1xf32> to vector<16x16xf32>
    %58 = arith.divf %54, %57 : vector<16x16xf32>
    %59 = vector.broadcast %10 : vector<1x32xf32> to vector<16x32xf32>
    %60 = arith.mulf %27, %59 : vector<16x32xf32>
    %cst_30 = arith.constant dense<0.000000e+00> : vector<16x32xf32>
    %61 = tpu.matmul %58, %60, %cst_30 {dimension_numbers = #tpu.dot_dimension_numbers<[1], [0], [0], [1], [0, 0, 1, 1], [], []>} : vector<16x16xf32>, vector<16x32xf32>, vector<16x32xf32> -> vector<16x32xf32>
    %62 = arith.addf %45, %61 : vector<16x32xf32>
    %63 = vector.broadcast %11 : vector<1x32xf32> to vector<16x32xf32>
    %64 = arith.mulf %17, %63 : vector<16x32xf32>
    %cst_31 = arith.constant dense<0.000000e+00> : vector<16x16xf32>
    %65 = tpu.matmul %64, %22, %cst_31 {dimension_numbers = #tpu.dot_dimension_numbers<[1], [1], [0], [0], [0, 0, 1, 0], [], []>} : vector<16x32xf32>, vector<16x32xf32>, vector<16x16xf32> -> vector<16x16xf32>
    %66 = arith.addf %65, %8 : vector<16x16xf32>
    %cst_32 = arith.constant dense<0xFF800000> : vector<16xf32>
    %67 = vector.multi_reduction <maximumf>, %66, %cst_32 [1] : vector<16x16xf32> to vector<16xf32>
    %68 = vector.shape_cast %67 : vector<16xf32> to vector<16x1xf32>
    %69 = vector.broadcast %68 : vector<16x1xf32> to vector<16x16xf32>
    %70 = arith.subf %66, %69 : vector<16x16xf32>
    %71 = math.exp %70 : vector<16x16xf32>
    %cst_33 = arith.constant dense<0.000000e+00> : vector<16xf32>
    %72 = vector.multi_reduction <add>, %71, %cst_33 [1] : vector<16x16xf32> to vector<16xf32>
    %73 = vector.shape_cast %72 : vector<16xf32> to vector<16x1xf32>
    %74 = vector.broadcast %73 : vector<16x1xf32> to vector<16x16xf32>
    %75 = arith.divf %71, %74 : vector<16x16xf32>
    %76 = vector.broadcast %11 : vector<1x32xf32> to vector<16x32xf32>
    %77 = arith.mulf %27, %76 : vector<16x32xf32>
    %cst_34 = arith.constant dense<0.000000e+00> : vector<16x32xf32>
    %78 = tpu.matmul %75, %77, %cst_34 {dimension_numbers = #tpu.dot_dimension_numbers<[1], [0], [0], [1], [0, 0, 1, 1], [], []>} : vector<16x16xf32>, vector<16x32xf32>, vector<16x32xf32> -> vector<16x32xf32>
    %79 = arith.addf %62, %78 : vector<16x32xf32>
    %80 = vector.broadcast %12 : vector<1x32xf32> to vector<16x32xf32>
    %81 = arith.mulf %17, %80 : vector<16x32xf32>
    %cst_35 = arith.constant dense<0.000000e+00> : vector<16x16xf32>
    %82 = tpu.matmul %81, %22, %cst_35 {dimension_numbers = #tpu.dot_dimension_numbers<[1], [1], [0], [0], [0, 0, 1, 0], [], []>} : vector<16x32xf32>, vector<16x32xf32>, vector<16x16xf32> -> vector<16x16xf32>
    %83 = arith.addf %82, %8 : vector<16x16xf32>
    %cst_36 = arith.constant dense<0xFF800000> : vector<16xf32>
    %84 = vector.multi_reduction <maximumf>, %83, %cst_36 [1] : vector<16x16xf32> to vector<16xf32>
    %85 = vector.shape_cast %84 : vector<16xf32> to vector<16x1xf32>
    %86 = vector.broadcast %85 : vector<16x1xf32> to vector<16x16xf32>
    %87 = arith.subf %83, %86 : vector<16x16xf32>
    %88 = math.exp %87 : vector<16x16xf32>
    %cst_37 = arith.constant dense<0.000000e+00> : vector<16xf32>
    %89 = vector.multi_reduction <add>, %88, %cst_37 [1] : vector<16x16xf32> to vector<16xf32>
    %90 = vector.shape_cast %89 : vector<16xf32> to vector<16x1xf32>
    %91 = vector.broadcast %90 : vector<16x1xf32> to vector<16x16xf32>
    %92 = arith.divf %88, %91 : vector<16x16xf32>
    %93 = vector.broadcast %12 : vector<1x32xf32> to vector<16x32xf32>
    %94 = arith.mulf %27, %93 : vector<16x32xf32>
    %cst_38 = arith.constant dense<0.000000e+00> : vector<16x32xf32>
    %95 = tpu.matmul %92, %94, %cst_38 {dimension_numbers = #tpu.dot_dimension_numbers<[1], [0], [0], [1], [0, 0, 1, 1], [], []>} : vector<16x16xf32>, vector<16x32xf32>, vector<16x32xf32> -> vector<16x32xf32>
    %96 = arith.addf %79, %95 : vector<16x32xf32>
    %c112 = arith.constant 112 : index
    %c0_39 = arith.constant 0 : index
    %97 = vector.load %arg3[%c112, %c0_39] : memref<528x64xf32, #tpu.memory_space<vmem>>, vector<32x32xf32>
    %cst_40 = arith.constant dense<0.000000e+00> : vector<16x32xf32>
    %98 = tpu.matmul %96, %97, %cst_40 {dimension_numbers = #tpu.dot_dimension_numbers<[1], [0], [0], [1], [0, 0, 1, 1], [], []>} : vector<16x32xf32>, vector<32x32xf32>, vector<16x32xf32> -> vector<16x32xf32>
    %c4 = arith.constant 4 : index
    %c0_41 = arith.constant 0 : index
    %99 = vector.load %arg4[%c4, %c0_41] : memref<32x64xf32, #tpu.memory_space<vmem>>, vector<1x32xf32>
    %100 = vector.broadcast %99 : vector<1x32xf32> to vector<16x32xf32>
    %101 = arith.addf %98, %100 : vector<16x32xf32>
    %102 = arith.addf %7, %101 : vector<16x32xf32>
    %c7 = arith.constant 7 : index
    %c0_42 = arith.constant 0 : index
    %103 = vector.load %arg4[%c7, %c0_42] : memref<32x64xf32, #tpu.memory_space<vmem>>, vector<1x32xf32>
    %c8 = arith.constant 8 : index
    %c0_43 = arith.constant 0 : index
    %104 = vector.load %arg4[%c8, %c0_43] : memref<32x64xf32, #tpu.memory_space<vmem>>, vector<1x32xf32>
    %cst_44 = arith.constant dense<0.000000e+00> : vector<16xf32>
    %105 = vector.multi_reduction <add>, %102, %cst_44 [1] : vector<16x32xf32> to vector<16xf32>
    %106 = vector.shape_cast %105 : vector<16xf32> to vector<16x1xf32>
    %cst_45 = arith.constant 3.200000e+01 : f32
    %107 = vector.broadcast %cst_45 : f32 to vector<16x1xf32>
    %108 = arith.divf %106, %107 : vector<16x1xf32>
    %109 = vector.broadcast %108 : vector<16x1xf32> to vector<16x32xf32>
    %110 = arith.subf %102, %109 : vector<16x32xf32>
    %111 = arith.mulf %110, %110 : vector<16x32xf32>
    %cst_46 = arith.constant dense<0.000000e+00> : vector<16xf32>
    %112 = vector.multi_reduction <add>, %111, %cst_46 [1] : vector<16x32xf32> to vector<16xf32>
    %113 = vector.shape_cast %112 : vector<16xf32> to vector<16x1xf32>
    %cst_47 = arith.constant 3.200000e+01 : f32
    %114 = vector.broadcast %cst_47 : f32 to vector<16x1xf32>
    %115 = arith.divf %113, %114 : vector<16x1xf32>
    %116 = vector.broadcast %108 : vector<16x1xf32> to vector<16x32xf32>
    %117 = arith.subf %102, %116 : vector<16x32xf32>
    %cst_48 = arith.constant 9.99999974E-6 : f32
    %118 = vector.broadcast %cst_48 : f32 to vector<16x1xf32>
    %119 = arith.addf %115, %118 : vector<16x1xf32>
    %120 = math.rsqrt %119 : vector<16x1xf32>
    %121 = vector.broadcast %120 : vector<16x1xf32> to vector<16x32xf32>
    %122 = arith.mulf %117, %121 : vector<16x32xf32>
    %123 = vector.broadcast %103 : vector<1x32xf32> to vector<16x32xf32>
    %124 = arith.mulf %122, %123 : vector<16x32xf32>
    %125 = vector.broadcast %104 : vector<1x32xf32> to vector<16x32xf32>
    %126 = arith.addf %124, %125 : vector<16x32xf32>
    %c144 = arith.constant 144 : index
    %c0_49 = arith.constant 0 : index
    %127 = vector.load %arg3[%c144, %c0_49] : memref<528x64xf32, #tpu.memory_space<vmem>>, vector<32x64xf32>
    %cst_50 = arith.constant dense<0.000000e+00> : vector<16x64xf32>
    %128 = tpu.matmul %126, %127, %cst_50 {dimension_numbers = #tpu.dot_dimension_numbers<[1], [0], [0], [1], [0, 0, 1, 1], [], []>} : vector<16x32xf32>, vector<32x64xf32>, vector<16x64xf32> -> vector<16x64xf32>
    %c5 = arith.constant 5 : index
    %c0_51 = arith.constant 0 : index
    %129 = vector.load %arg4[%c5, %c0_51] : memref<32x64xf32, #tpu.memory_space<vmem>>, vector<1x64xf32>
    %130 = vector.broadcast %129 : vector<1x64xf32> to vector<16x64xf32>
    %131 = arith.addf %128, %130 : vector<16x64xf32>
    %cst_52 = arith.constant 0.000000e+00 : f32
    %132 = vector.broadcast %cst_52 : f32 to vector<16x64xf32>
    %133 = arith.maximumf %131, %132 : vector<16x64xf32>
    %c176 = arith.constant 176 : index
    %c0_53 = arith.constant 0 : index
    %134 = vector.load %arg3[%c176, %c0_53] : memref<528x64xf32, #tpu.memory_space<vmem>>, vector<64x32xf32>
    %cst_54 = arith.constant dense<0.000000e+00> : vector<16x32xf32>
    %135 = tpu.matmul %133, %134, %cst_54 {dimension_numbers = #tpu.dot_dimension_numbers<[1], [0], [0], [1], [0, 0, 1, 1], [], []>} : vector<16x64xf32>, vector<64x32xf32>, vector<16x32xf32> -> vector<16x32xf32>
    %c6 = arith.constant 6 : index
    %c0_55 = arith.constant 0 : index
    %136 = vector.load %arg4[%c6, %c0_55] : memref<32x64xf32, #tpu.memory_space<vmem>>, vector<1x32xf32>
    %137 = vector.broadcast %136 : vector<1x32xf32> to vector<16x32xf32>
    %138 = arith.addf %135, %137 : vector<16x32xf32>
    %139 = arith.addf %126, %138 : vector<16x32xf32>
    %c9 = arith.constant 9 : index
    %c0_56 = arith.constant 0 : index
    %140 = vector.load %arg4[%c9, %c0_56] : memref<32x64xf32, #tpu.memory_space<vmem>>, vector<1x32xf32>
    %c10 = arith.constant 10 : index
    %c0_57 = arith.constant 0 : index
    %141 = vector.load %arg4[%c10, %c0_57] : memref<32x64xf32, #tpu.memory_space<vmem>>, vector<1x32xf32>
    %cst_58 = arith.constant dense<0.000000e+00> : vector<16xf32>
    %142 = vector.multi_reduction <add>, %139, %cst_58 [1] : vector<16x32xf32> to vector<16xf32>
    %143 = vector.shape_cast %142 : vector<16xf32> to vector<16x1xf32>
    %cst_59 = arith.constant 3.200000e+01 : f32
    %144 = vector.broadcast %cst_59 : f32 to vector<16x1xf32>
    %145 = arith.divf %143, %144 : vector<16x1xf32>
    %146 = vector.broadcast %145 : vector<16x1xf32> to vector<16x32xf32>
    %147 = arith.subf %139, %146 : vector<16x32xf32>
    %148 = arith.mulf %147, %147 : vector<16x32xf32>
    %cst_60 = arith.constant dense<0.000000e+00> : vector<16xf32>
    %149 = vector.multi_reduction <add>, %148, %cst_60 [1] : vector<16x32xf32> to vector<16xf32>
    %150 = vector.shape_cast %149 : vector<16xf32> to vector<16x1xf32>
    %cst_61 = arith.constant 3.200000e+01 : f32
    %151 = vector.broadcast %cst_61 : f32 to vector<16x1xf32>
    %152 = arith.divf %150, %151 : vector<16x1xf32>
    %153 = vector.broadcast %145 : vector<16x1xf32> to vector<16x32xf32>
    %154 = arith.subf %139, %153 : vector<16x32xf32>
    %cst_62 = arith.constant 9.99999974E-6 : f32
    %155 = vector.broadcast %cst_62 : f32 to vector<16x1xf32>
    %156 = arith.addf %152, %155 : vector<16x1xf32>
    %157 = math.rsqrt %156 : vector<16x1xf32>
    %158 = vector.broadcast %157 : vector<16x1xf32> to vector<16x32xf32>
    %159 = arith.mulf %154, %158 : vector<16x32xf32>
    %160 = vector.broadcast %140 : vector<1x32xf32> to vector<16x32xf32>
    %161 = arith.mulf %159, %160 : vector<16x32xf32>
    %162 = vector.broadcast %141 : vector<1x32xf32> to vector<16x32xf32>
    %163 = arith.addf %161, %162 : vector<16x32xf32>
    %c240 = arith.constant 240 : index
    %c0_63 = arith.constant 0 : index
    %164 = vector.load %arg3[%c240, %c0_63] : memref<528x64xf32, #tpu.memory_space<vmem>>, vector<32x32xf32>
    %cst_64 = arith.constant dense<0.000000e+00> : vector<16x32xf32>
    %165 = tpu.matmul %163, %164, %cst_64 {dimension_numbers = #tpu.dot_dimension_numbers<[1], [0], [0], [1], [0, 0, 1, 1], [], []>} : vector<16x32xf32>, vector<32x32xf32>, vector<16x32xf32> -> vector<16x32xf32>
    %c11 = arith.constant 11 : index
    %c0_65 = arith.constant 0 : index
    %166 = vector.load %arg4[%c11, %c0_65] : memref<32x64xf32, #tpu.memory_space<vmem>>, vector<1x32xf32>
    %167 = vector.broadcast %166 : vector<1x32xf32> to vector<16x32xf32>
    %168 = arith.addf %165, %167 : vector<16x32xf32>
    %c272 = arith.constant 272 : index
    %c0_66 = arith.constant 0 : index
    %169 = vector.load %arg3[%c272, %c0_66] : memref<528x64xf32, #tpu.memory_space<vmem>>, vector<32x32xf32>
    %cst_67 = arith.constant dense<0.000000e+00> : vector<16x32xf32>
    %170 = tpu.matmul %163, %169, %cst_67 {dimension_numbers = #tpu.dot_dimension_numbers<[1], [0], [0], [1], [0, 0, 1, 1], [], []>} : vector<16x32xf32>, vector<32x32xf32>, vector<16x32xf32> -> vector<16x32xf32>
    %c12 = arith.constant 12 : index
    %c0_68 = arith.constant 0 : index
    %171 = vector.load %arg4[%c12, %c0_68] : memref<32x64xf32, #tpu.memory_space<vmem>>, vector<1x32xf32>
    %172 = vector.broadcast %171 : vector<1x32xf32> to vector<16x32xf32>
    %173 = arith.addf %170, %172 : vector<16x32xf32>
    %c304 = arith.constant 304 : index
    %c0_69 = arith.constant 0 : index
    %174 = vector.load %arg3[%c304, %c0_69] : memref<528x64xf32, #tpu.memory_space<vmem>>, vector<32x32xf32>
    %cst_70 = arith.constant dense<0.000000e+00> : vector<16x32xf32>
    %175 = tpu.matmul %163, %174, %cst_70 {dimension_numbers = #tpu.dot_dimension_numbers<[1], [0], [0], [1], [0, 0, 1, 1], [], []>} : vector<16x32xf32>, vector<32x32xf32>, vector<16x32xf32> -> vector<16x32xf32>
    %c13 = arith.constant 13 : index
    %c0_71 = arith.constant 0 : index
    %176 = vector.load %arg4[%c13, %c0_71] : memref<32x64xf32, #tpu.memory_space<vmem>>, vector<1x32xf32>
    %177 = vector.broadcast %176 : vector<1x32xf32> to vector<16x32xf32>
    %178 = arith.addf %175, %177 : vector<16x32xf32>
    %cst_72 = arith.constant 0.000000e+00 : f32
    %179 = vector.broadcast %cst_72 : f32 to vector<16x32xf32>
    %180 = vector.broadcast %9 : vector<1x32xf32> to vector<16x32xf32>
    %181 = arith.mulf %168, %180 : vector<16x32xf32>
    %cst_73 = arith.constant dense<0.000000e+00> : vector<16x16xf32>
    %182 = tpu.matmul %181, %173, %cst_73 {dimension_numbers = #tpu.dot_dimension_numbers<[1], [1], [0], [0], [0, 0, 1, 0], [], []>} : vector<16x32xf32>, vector<16x32xf32>, vector<16x16xf32> -> vector<16x16xf32>
    %183 = arith.addf %182, %8 : vector<16x16xf32>
    %cst_74 = arith.constant dense<0xFF800000> : vector<16xf32>
    %184 = vector.multi_reduction <maximumf>, %183, %cst_74 [1] : vector<16x16xf32> to vector<16xf32>
    %185 = vector.shape_cast %184 : vector<16xf32> to vector<16x1xf32>
    %186 = vector.broadcast %185 : vector<16x1xf32> to vector<16x16xf32>
    %187 = arith.subf %183, %186 : vector<16x16xf32>
    %188 = math.exp %187 : vector<16x16xf32>
    %cst_75 = arith.constant dense<0.000000e+00> : vector<16xf32>
    %189 = vector.multi_reduction <add>, %188, %cst_75 [1] : vector<16x16xf32> to vector<16xf32>
    %190 = vector.shape_cast %189 : vector<16xf32> to vector<16x1xf32>
    %191 = vector.broadcast %190 : vector<16x1xf32> to vector<16x16xf32>
    %192 = arith.divf %188, %191 : vector<16x16xf32>
    %193 = vector.broadcast %9 : vector<1x32xf32> to vector<16x32xf32>
    %194 = arith.mulf %178, %193 : vector<16x32xf32>
    %cst_76 = arith.constant dense<0.000000e+00> : vector<16x32xf32>
    %195 = tpu.matmul %192, %194, %cst_76 {dimension_numbers = #tpu.dot_dimension_numbers<[1], [0], [0], [1], [0, 0, 1, 1], [], []>} : vector<16x16xf32>, vector<16x32xf32>, vector<16x32xf32> -> vector<16x32xf32>
    %196 = arith.addf %179, %195 : vector<16x32xf32>
    %197 = vector.broadcast %10 : vector<1x32xf32> to vector<16x32xf32>
    %198 = arith.mulf %168, %197 : vector<16x32xf32>
    %cst_77 = arith.constant dense<0.000000e+00> : vector<16x16xf32>
    %199 = tpu.matmul %198, %173, %cst_77 {dimension_numbers = #tpu.dot_dimension_numbers<[1], [1], [0], [0], [0, 0, 1, 0], [], []>} : vector<16x32xf32>, vector<16x32xf32>, vector<16x16xf32> -> vector<16x16xf32>
    %200 = arith.addf %199, %8 : vector<16x16xf32>
    %cst_78 = arith.constant dense<0xFF800000> : vector<16xf32>
    %201 = vector.multi_reduction <maximumf>, %200, %cst_78 [1] : vector<16x16xf32> to vector<16xf32>
    %202 = vector.shape_cast %201 : vector<16xf32> to vector<16x1xf32>
    %203 = vector.broadcast %202 : vector<16x1xf32> to vector<16x16xf32>
    %204 = arith.subf %200, %203 : vector<16x16xf32>
    %205 = math.exp %204 : vector<16x16xf32>
    %cst_79 = arith.constant dense<0.000000e+00> : vector<16xf32>
    %206 = vector.multi_reduction <add>, %205, %cst_79 [1] : vector<16x16xf32> to vector<16xf32>
    %207 = vector.shape_cast %206 : vector<16xf32> to vector<16x1xf32>
    %208 = vector.broadcast %207 : vector<16x1xf32> to vector<16x16xf32>
    %209 = arith.divf %205, %208 : vector<16x16xf32>
    %210 = vector.broadcast %10 : vector<1x32xf32> to vector<16x32xf32>
    %211 = arith.mulf %178, %210 : vector<16x32xf32>
    %cst_80 = arith.constant dense<0.000000e+00> : vector<16x32xf32>
    %212 = tpu.matmul %209, %211, %cst_80 {dimension_numbers = #tpu.dot_dimension_numbers<[1], [0], [0], [1], [0, 0, 1, 1], [], []>} : vector<16x16xf32>, vector<16x32xf32>, vector<16x32xf32> -> vector<16x32xf32>
    %213 = arith.addf %196, %212 : vector<16x32xf32>
    %214 = vector.broadcast %11 : vector<1x32xf32> to vector<16x32xf32>
    %215 = arith.mulf %168, %214 : vector<16x32xf32>
    %cst_81 = arith.constant dense<0.000000e+00> : vector<16x16xf32>
    %216 = tpu.matmul %215, %173, %cst_81 {dimension_numbers = #tpu.dot_dimension_numbers<[1], [1], [0], [0], [0, 0, 1, 0], [], []>} : vector<16x32xf32>, vector<16x32xf32>, vector<16x16xf32> -> vector<16x16xf32>
    %217 = arith.addf %216, %8 : vector<16x16xf32>
    %cst_82 = arith.constant dense<0xFF800000> : vector<16xf32>
    %218 = vector.multi_reduction <maximumf>, %217, %cst_82 [1] : vector<16x16xf32> to vector<16xf32>
    %219 = vector.shape_cast %218 : vector<16xf32> to vector<16x1xf32>
    %220 = vector.broadcast %219 : vector<16x1xf32> to vector<16x16xf32>
    %221 = arith.subf %217, %220 : vector<16x16xf32>
    %222 = math.exp %221 : vector<16x16xf32>
    %cst_83 = arith.constant dense<0.000000e+00> : vector<16xf32>
    %223 = vector.multi_reduction <add>, %222, %cst_83 [1] : vector<16x16xf32> to vector<16xf32>
    %224 = vector.shape_cast %223 : vector<16xf32> to vector<16x1xf32>
    %225 = vector.broadcast %224 : vector<16x1xf32> to vector<16x16xf32>
    %226 = arith.divf %222, %225 : vector<16x16xf32>
    %227 = vector.broadcast %11 : vector<1x32xf32> to vector<16x32xf32>
    %228 = arith.mulf %178, %227 : vector<16x32xf32>
    %cst_84 = arith.constant dense<0.000000e+00> : vector<16x32xf32>
    %229 = tpu.matmul %226, %228, %cst_84 {dimension_numbers = #tpu.dot_dimension_numbers<[1], [0], [0], [1], [0, 0, 1, 1], [], []>} : vector<16x16xf32>, vector<16x32xf32>, vector<16x32xf32> -> vector<16x32xf32>
    %230 = arith.addf %213, %229 : vector<16x32xf32>
    %231 = vector.broadcast %12 : vector<1x32xf32> to vector<16x32xf32>
    %232 = arith.mulf %168, %231 : vector<16x32xf32>
    %cst_85 = arith.constant dense<0.000000e+00> : vector<16x16xf32>
    %233 = tpu.matmul %232, %173, %cst_85 {dimension_numbers = #tpu.dot_dimension_numbers<[1], [1], [0], [0], [0, 0, 1, 0], [], []>} : vector<16x32xf32>, vector<16x32xf32>, vector<16x16xf32> -> vector<16x16xf32>
    %234 = arith.addf %233, %8 : vector<16x16xf32>
    %cst_86 = arith.constant dense<0xFF800000> : vector<16xf32>
    %235 = vector.multi_reduction <maximumf>, %234, %cst_86 [1] : vector<16x16xf32> to vector<16xf32>
    %236 = vector.shape_cast %235 : vector<16xf32> to vector<16x1xf32>
    %237 = vector.broadcast %236 : vector<16x1xf32> to vector<16x16xf32>
    %238 = arith.subf %234, %237 : vector<16x16xf32>
    %239 = math.exp %238 : vector<16x16xf32>
    %cst_87 = arith.constant dense<0.000000e+00> : vector<16xf32>
    %240 = vector.multi_reduction <add>, %239, %cst_87 [1] : vector<16x16xf32> to vector<16xf32>
    %241 = vector.shape_cast %240 : vector<16xf32> to vector<16x1xf32>
    %242 = vector.broadcast %241 : vector<16x1xf32> to vector<16x16xf32>
    %243 = arith.divf %239, %242 : vector<16x16xf32>
    %244 = vector.broadcast %12 : vector<1x32xf32> to vector<16x32xf32>
    %245 = arith.mulf %178, %244 : vector<16x32xf32>
    %cst_88 = arith.constant dense<0.000000e+00> : vector<16x32xf32>
    %246 = tpu.matmul %243, %245, %cst_88 {dimension_numbers = #tpu.dot_dimension_numbers<[1], [0], [0], [1], [0, 0, 1, 1], [], []>} : vector<16x16xf32>, vector<16x32xf32>, vector<16x32xf32> -> vector<16x32xf32>
    %247 = arith.addf %230, %246 : vector<16x32xf32>
    %c336 = arith.constant 336 : index
    %c0_89 = arith.constant 0 : index
    %248 = vector.load %arg3[%c336, %c0_89] : memref<528x64xf32, #tpu.memory_space<vmem>>, vector<32x32xf32>
    %cst_90 = arith.constant dense<0.000000e+00> : vector<16x32xf32>
    %249 = tpu.matmul %247, %248, %cst_90 {dimension_numbers = #tpu.dot_dimension_numbers<[1], [0], [0], [1], [0, 0, 1, 1], [], []>} : vector<16x32xf32>, vector<32x32xf32>, vector<16x32xf32> -> vector<16x32xf32>
    %c14 = arith.constant 14 : index
    %c0_91 = arith.constant 0 : index
    %250 = vector.load %arg4[%c14, %c0_91] : memref<32x64xf32, #tpu.memory_space<vmem>>, vector<1x32xf32>
    %251 = vector.broadcast %250 : vector<1x32xf32> to vector<16x32xf32>
    %252 = arith.addf %249, %251 : vector<16x32xf32>
    %253 = arith.addf %163, %252 : vector<16x32xf32>
    %c17 = arith.constant 17 : index
    %c0_92 = arith.constant 0 : index
    %254 = vector.load %arg4[%c17, %c0_92] : memref<32x64xf32, #tpu.memory_space<vmem>>, vector<1x32xf32>
    %c18 = arith.constant 18 : index
    %c0_93 = arith.constant 0 : index
    %255 = vector.load %arg4[%c18, %c0_93] : memref<32x64xf32, #tpu.memory_space<vmem>>, vector<1x32xf32>
    %cst_94 = arith.constant dense<0.000000e+00> : vector<16xf32>
    %256 = vector.multi_reduction <add>, %253, %cst_94 [1] : vector<16x32xf32> to vector<16xf32>
    %257 = vector.shape_cast %256 : vector<16xf32> to vector<16x1xf32>
    %cst_95 = arith.constant 3.200000e+01 : f32
    %258 = vector.broadcast %cst_95 : f32 to vector<16x1xf32>
    %259 = arith.divf %257, %258 : vector<16x1xf32>
    %260 = vector.broadcast %259 : vector<16x1xf32> to vector<16x32xf32>
    %261 = arith.subf %253, %260 : vector<16x32xf32>
    %262 = arith.mulf %261, %261 : vector<16x32xf32>
    %cst_96 = arith.constant dense<0.000000e+00> : vector<16xf32>
    %263 = vector.multi_reduction <add>, %262, %cst_96 [1] : vector<16x32xf32> to vector<16xf32>
    %264 = vector.shape_cast %263 : vector<16xf32> to vector<16x1xf32>
    %cst_97 = arith.constant 3.200000e+01 : f32
    %265 = vector.broadcast %cst_97 : f32 to vector<16x1xf32>
    %266 = arith.divf %264, %265 : vector<16x1xf32>
    %267 = vector.broadcast %259 : vector<16x1xf32> to vector<16x32xf32>
    %268 = arith.subf %253, %267 : vector<16x32xf32>
    %cst_98 = arith.constant 9.99999974E-6 : f32
    %269 = vector.broadcast %cst_98 : f32 to vector<16x1xf32>
    %270 = arith.addf %266, %269 : vector<16x1xf32>
    %271 = math.rsqrt %270 : vector<16x1xf32>
    %272 = vector.broadcast %271 : vector<16x1xf32> to vector<16x32xf32>
    %273 = arith.mulf %268, %272 : vector<16x32xf32>
    %274 = vector.broadcast %254 : vector<1x32xf32> to vector<16x32xf32>
    %275 = arith.mulf %273, %274 : vector<16x32xf32>
    %276 = vector.broadcast %255 : vector<1x32xf32> to vector<16x32xf32>
    %277 = arith.addf %275, %276 : vector<16x32xf32>
    %c368 = arith.constant 368 : index
    %c0_99 = arith.constant 0 : index
    %278 = vector.load %arg3[%c368, %c0_99] : memref<528x64xf32, #tpu.memory_space<vmem>>, vector<32x64xf32>
    %cst_100 = arith.constant dense<0.000000e+00> : vector<16x64xf32>
    %279 = tpu.matmul %277, %278, %cst_100 {dimension_numbers = #tpu.dot_dimension_numbers<[1], [0], [0], [1], [0, 0, 1, 1], [], []>} : vector<16x32xf32>, vector<32x64xf32>, vector<16x64xf32> -> vector<16x64xf32>
    %c15 = arith.constant 15 : index
    %c0_101 = arith.constant 0 : index
    %280 = vector.load %arg4[%c15, %c0_101] : memref<32x64xf32, #tpu.memory_space<vmem>>, vector<1x64xf32>
    %281 = vector.broadcast %280 : vector<1x64xf32> to vector<16x64xf32>
    %282 = arith.addf %279, %281 : vector<16x64xf32>
    %cst_102 = arith.constant 0.000000e+00 : f32
    %283 = vector.broadcast %cst_102 : f32 to vector<16x64xf32>
    %284 = arith.maximumf %282, %283 : vector<16x64xf32>
    %c400 = arith.constant 400 : index
    %c0_103 = arith.constant 0 : index
    %285 = vector.load %arg3[%c400, %c0_103] : memref<528x64xf32, #tpu.memory_space<vmem>>, vector<64x32xf32>
    %cst_104 = arith.constant dense<0.000000e+00> : vector<16x32xf32>
    %286 = tpu.matmul %284, %285, %cst_104 {dimension_numbers = #tpu.dot_dimension_numbers<[1], [0], [0], [1], [0, 0, 1, 1], [], []>} : vector<16x64xf32>, vector<64x32xf32>, vector<16x32xf32> -> vector<16x32xf32>
    %c16_105 = arith.constant 16 : index
    %c0_106 = arith.constant 0 : index
    %287 = vector.load %arg4[%c16_105, %c0_106] : memref<32x64xf32, #tpu.memory_space<vmem>>, vector<1x32xf32>
    %288 = vector.broadcast %287 : vector<1x32xf32> to vector<16x32xf32>
    %289 = arith.addf %286, %288 : vector<16x32xf32>
    %290 = arith.addf %277, %289 : vector<16x32xf32>
    %c19 = arith.constant 19 : index
    %c0_107 = arith.constant 0 : index
    %291 = vector.load %arg4[%c19, %c0_107] : memref<32x64xf32, #tpu.memory_space<vmem>>, vector<1x32xf32>
    %c20 = arith.constant 20 : index
    %c0_108 = arith.constant 0 : index
    %292 = vector.load %arg4[%c20, %c0_108] : memref<32x64xf32, #tpu.memory_space<vmem>>, vector<1x32xf32>
    %cst_109 = arith.constant dense<0.000000e+00> : vector<16xf32>
    %293 = vector.multi_reduction <add>, %290, %cst_109 [1] : vector<16x32xf32> to vector<16xf32>
    %294 = vector.shape_cast %293 : vector<16xf32> to vector<16x1xf32>
    %cst_110 = arith.constant 3.200000e+01 : f32
    %295 = vector.broadcast %cst_110 : f32 to vector<16x1xf32>
    %296 = arith.divf %294, %295 : vector<16x1xf32>
    %297 = vector.broadcast %296 : vector<16x1xf32> to vector<16x32xf32>
    %298 = arith.subf %290, %297 : vector<16x32xf32>
    %299 = arith.mulf %298, %298 : vector<16x32xf32>
    %cst_111 = arith.constant dense<0.000000e+00> : vector<16xf32>
    %300 = vector.multi_reduction <add>, %299, %cst_111 [1] : vector<16x32xf32> to vector<16xf32>
    %301 = vector.shape_cast %300 : vector<16xf32> to vector<16x1xf32>
    %cst_112 = arith.constant 3.200000e+01 : f32
    %302 = vector.broadcast %cst_112 : f32 to vector<16x1xf32>
    %303 = arith.divf %301, %302 : vector<16x1xf32>
    %304 = vector.broadcast %296 : vector<16x1xf32> to vector<16x32xf32>
    %305 = arith.subf %290, %304 : vector<16x32xf32>
    %cst_113 = arith.constant 9.99999974E-6 : f32
    %306 = vector.broadcast %cst_113 : f32 to vector<16x1xf32>
    %307 = arith.addf %303, %306 : vector<16x1xf32>
    %308 = math.rsqrt %307 : vector<16x1xf32>
    %309 = vector.broadcast %308 : vector<16x1xf32> to vector<16x32xf32>
    %310 = arith.mulf %305, %309 : vector<16x32xf32>
    %311 = vector.broadcast %291 : vector<1x32xf32> to vector<16x32xf32>
    %312 = arith.mulf %310, %311 : vector<16x32xf32>
    %313 = vector.broadcast %292 : vector<1x32xf32> to vector<16x32xf32>
    %314 = arith.addf %312, %313 : vector<16x32xf32>
    %c0_114 = arith.constant 0 : index
    %c0_115 = arith.constant 0 : index
    %315 = vector.load %arg7[%c0_114, %c0_115] : memref<16x32xf32, #tpu.memory_space<vmem>>, vector<16x32xf32>
    tpu.vector_store %arg7[%c0_114, %c0_115], %314 {strides = array<i32>} : memref<16x32xf32, #tpu.memory_space<vmem>>, vector<16x32xf32>,
    %316 = vector.extract_strided_slice %314 {offsets = [0, 0], sizes = [8, 32], strides = [1, 1]} : vector<16x32xf32> to vector<8x32xf32>
    %cst_116 = arith.constant dense<0.000000e+00> : vector<32xf32>
    %317 = vector.multi_reduction <add>, %316, %cst_116 [0] : vector<8x32xf32> to vector<32xf32>
    %318 = vector.shape_cast %317 : vector<32xf32> to vector<1x32xf32>
    %cst_117 = arith.constant 8.000000e+00 : f32
    %319 = vector.broadcast %cst_117 : f32 to vector<1x32xf32>
    %320 = arith.divf %318, %319 : vector<1x32xf32>
    %321 = vector.extract_strided_slice %314 {offsets = [8, 0], sizes = [8, 32], strides = [1, 1]} : vector<16x32xf32> to vector<8x32xf32>
    %cst_118 = arith.constant dense<0.000000e+00> : vector<32xf32>
    %322 = vector.multi_reduction <add>, %321, %cst_118 [0] : vector<8x32xf32> to vector<32xf32>
    %323 = vector.shape_cast %322 : vector<32xf32> to vector<1x32xf32>
    %cst_119 = arith.constant 8.000000e+00 : f32
    %324 = vector.broadcast %cst_119 : f32 to vector<1x32xf32>
    %325 = arith.divf %323, %324 : vector<1x32xf32>
    %326 = tpu.concatenate %320, %325 in 0 : vector<1x32xf32>, vector<1x32xf32> -> vector<2x32xf32>
    %c496 = arith.constant 496 : index
    %c0_120 = arith.constant 0 : index
    %327 = vector.load %arg3[%c496, %c0_120] : memref<528x64xf32, #tpu.memory_space<vmem>>, vector<32x32xf32>
    %cst_121 = arith.constant dense<0.000000e+00> : vector<2x32xf32>
    %328 = tpu.matmul %326, %327, %cst_121 {dimension_numbers = #tpu.dot_dimension_numbers<[1], [0], [0], [1], [0, 0, 1, 1], [], []>} : vector<2x32xf32>, vector<32x32xf32>, vector<2x32xf32> -> vector<2x32xf32>
    %c22 = arith.constant 22 : index
    %c0_122 = arith.constant 0 : index
    %329 = vector.load %arg4[%c22, %c0_122] : memref<32x64xf32, #tpu.memory_space<vmem>>, vector<1x32xf32>
    %330 = vector.broadcast %329 : vector<1x32xf32> to vector<2x32xf32>
    %331 = arith.addf %328, %330 : vector<2x32xf32>
    %c23 = arith.constant 23 : index
    %c0_123 = arith.constant 0 : index
    %332 = vector.load %arg4[%c23, %c0_123] : memref<32x64xf32, #tpu.memory_space<vmem>>, vector<1x32xf32>
    %c0_124 = arith.constant 0 : index
    %333 = memref.load %arg5[%c0_124] : memref<2xi32, #tpu.memory_space<smem>>
    %c0_i32 = arith.constant 0 : i32
    %334 = arith.maxsi %333, %c0_i32 : i32
    %c0_i32_125 = arith.constant 0 : i32
    %335 = arith.addi %c0_i32_125, %334 : i32
    %336 = arith.index_cast %335 : i32 to index
    %c0_126 = arith.constant 0 : index
    %337 = vector.load %arg7[%336, %c0_126] : memref<16x32xf32, #tpu.memory_space<vmem>>, vector<1x32xf32>
    %c0_i32_127 = arith.constant 0 : i32
    %338 = arith.cmpi sge, %333, %c0_i32_127 : i32
    %339 = arith.extui %338 : i1 to i32
    %340 = arith.sitofp %339 : i32 to f32
    %341 = vector.broadcast %340 : f32 to vector<1x32xf32>
    %342 = arith.mulf %337, %341 : vector<1x32xf32>
    %cst_128 = arith.constant 1.000000e+00 : f32
    %343 = arith.subf %cst_128, %340 : f32
    %344 = vector.broadcast %343 : f32 to vector<1x32xf32>
    %345 = arith.mulf %332, %344 : vector<1x32xf32>
    %346 = arith.addf %342, %345 : vector<1x32xf32>
    %c1_129 = arith.constant 1 : index
    %347 = memref.load %arg5[%c1_129] : memref<2xi32, #tpu.memory_space<smem>>
    %c0_i32_130 = arith.constant 0 : i32
    %348 = arith.maxsi %347, %c0_i32_130 : i32
    %c8_i32 = arith.constant 8 : i32
    %349 = arith.addi %c8_i32, %348 : i32
    %350 = arith.index_cast %349 : i32 to index
    %c0_131 = arith.constant 0 : index
    %351 = vector.load %arg7[%350, %c0_131] : memref<16x32xf32, #tpu.memory_space<vmem>>, vector<1x32xf32>
    %c0_i32_132 = arith.constant 0 : i32
    %352 = arith.cmpi sge, %347, %c0_i32_132 : i32
    %353 = arith.extui %352 : i1 to i32
    %354 = arith.sitofp %353 : i32 to f32
    %355 = vector.broadcast %354 : f32 to vector<1x32xf32>
    %356 = arith.mulf %351, %355 : vector<1x32xf32>
    %cst_133 = arith.constant 1.000000e+00 : f32
    %357 = arith.subf %cst_133, %354 : f32
    %358 = vector.broadcast %357 : f32 to vector<1x32xf32>
    %359 = arith.mulf %332, %358 : vector<1x32xf32>
    %360 = arith.addf %356, %359 : vector<1x32xf32>
    %361 = tpu.concatenate %346, %360 in 0 : vector<1x32xf32>, vector<1x32xf32> -> vector<2x32xf32>
    %c464 = arith.constant 464 : index
    %c0_134 = arith.constant 0 : index
    %362 = vector.load %arg3[%c464, %c0_134] : memref<528x64xf32, #tpu.memory_space<vmem>>, vector<32x32xf32>
    %cst_135 = arith.constant dense<0.000000e+00> : vector<2x32xf32>
    %363 = tpu.matmul %361, %362, %cst_135 {dimension_numbers = #tpu.dot_dimension_numbers<[1], [0], [0], [1], [0, 0, 1, 1], [], []>} : vector<2x32xf32>, vector<32x32xf32>, vector<2x32xf32> -> vector<2x32xf32>
    %c21 = arith.constant 21 : index
    %c0_136 = arith.constant 0 : index
    %364 = vector.load %arg4[%c21, %c0_136] : memref<32x64xf32, #tpu.memory_space<vmem>>, vector<1x32xf32>
    %365 = vector.broadcast %364 : vector<1x32xf32> to vector<2x32xf32>
    %366 = arith.addf %363, %365 : vector<2x32xf32>
    %cst_137 = arith.constant 0.000000e+00 : f32
    %367 = vector.broadcast %cst_137 : f32 to vector<2x128xf32>
    %c0_138 = arith.constant 0 : index
    %c0_139 = arith.constant 0 : index
    %368 = vector.load %arg6[%c0_138, %c0_139] : memref<2x128xf32, #tpu.memory_space<vmem>>, vector<2x128xf32>
    tpu.vector_store %arg6[%c0_138, %c0_139], %367 {strides = array<i32>} : memref<2x128xf32, #tpu.memory_space<vmem>>, vector<2x128xf32>,
    %c0_140 = arith.constant 0 : index
    %c0_141 = arith.constant 0 : index
    %369 = vector.load %arg6[%c0_140, %c0_141] : memref<2x128xf32, #tpu.memory_space<vmem>>, vector<2x32xf32>
    tpu.vector_store %arg6[%c0_140, %c0_141], %331 {strides = array<i32>} : memref<2x128xf32, #tpu.memory_space<vmem>>, vector<2x32xf32>,
    %c0_142 = arith.constant 0 : index
    %c32 = arith.constant 32 : index
    %370 = vector.load %arg6[%c0_142, %c32] : memref<2x128xf32, #tpu.memory_space<vmem>>, vector<2x32xf32>
    tpu.vector_store %arg6[%c0_142, %c32], %366 {strides = array<i32>} : memref<2x128xf32, #tpu.memory_space<vmem>>, vector<2x32xf32>,
    return
  }
}

</mosaic_0001>

<bundles_post_ra>
// kernel: transformer_forward.1
= control target key start
LH: loop header
LB: loop body
LE: loop exit
PB: predicated region body
PF: predicated region fallthrough
CT: control target
= control target key end

     0   :  { %11 = vsyncpa [#allocation4], 0  ;;  %s4510_s0 = inlined_call_operand.vmem [shape: f32[16,16], index: 0, kind: input, shape index: {}]   ;;  %s4511_s1 = inlined_call_operand.vmem [shape: f32[16,32], index: 1, kind: input, shape index: {}]   ;;  %s4512_s2 = inlined_call_operand.vmem [shape: f32[16,16], index: 2, kind: input, shape index: {}]   ;;  %s4513_s3 = inlined_call_operand.vmem [shape: f32[528,64], index: 3, kind: input, shape index: {}]   ;;  %s4514_s4 = inlined_call_operand.vmem [shape: f32[32,64], index: 4, kind: input, shape index: {}]   ;;  %s4515_s5 = inlined_call_operand.vmem [shape: s32[2], index: 5, kind: input, shape index: {}]   ;;  %s4516_s6 = inlined_call_operand.vmem [shape: f32[2,128], index: 6, kind: output, shape index: {}]  }
   0x1   :  { %s28_s23 = sshll.u32 %s4515_s5, 4  ;;  %s29_s23 = int_to_ptr.vmem [resolvable:$true] %s28_s23 }
   0x2   :  { %s3793_s24 = scalar_lea.vmem %s29_s23, 16  ;;  %p3798_p1 = scmp.lt.s32.totalorder %s29_s23, %s29_s23 }
   0x3   :  { %p3794_p0 = scmp.ne.s32.totalorder %s29_s23, %s3793_s24  ;;  %p3799_p2 = scmp.lt.s32.totalorder %s3793_s24, %s3793_s24 }
   0x5   :  { %p3800_p3 = por %p3799_p2, %p3798_p1 }
   0x7   :  { %p3801_p4 = pnand %p3800_p3, %p3794_p0 }
   0x9   :  { %3804 = shalt.err (!%p3801_p4)
}
   0xa   :  { %s3807_s25 = smov [#allocation3]  }
   0xb   :  { %31 = dma.vmem_to_smem %s29_s23, 16, %s3807_s25, [#allocation4]  }
   0xc   :  { %3805 = dma.done.wait [#allocation4], 16  }
   0xd   :  { %3806 = vsyncadd [#allocation4], 4294967280 }
   0xe   :  { %35 = sfence }
   0xf   :  { %v39_v0 = vld [vmem:[%s4513_s3 + $0x8] sm:$0xff]  ;;  %v38_v1 = vld [vmem:[%s4513_s3] sm:$0xff]  ;;  %vm45_vm0 = vcmask 130048   ;;  %v138_v8 = vld [vmem:[%s4513_s3 + $0x18] sm:$0xff]  ;;  %vm146_vm1 = vcmask 261120   ;;  %vm1412_vm2 = vcmask 523264  }
  0x10   :  { %v36_v2 = vld [vmem:[%s4510_s0] sm:$0xff]  ;;  %3415 = vmatprep.subr.mxu0 %v39_v0  ;;  %v140_v3 = vld [vmem:[%s4513_s3 + $0x28] sm:$0xff]  ;;  %v229_v9 = vld [vmem:[%s4513_s3 + $0x38] sm:$0xff]  ;;  %vm3809_vm3 = vmmov 0   ;;  %s3253_s5 = sld [smem:[#allocation3 + $0x1]]  ;;  %vm2935_vm4 = vcmask 1040384  }
  0x11   :  { %3419 = vmatprep.mubr.msk.f32.mxu0 %vm45_vm0, %v36_v2  ;;  %3416 = vmatpush3.msra.mxu0 %v39_v0  ;;  %v37_v4 = vld [vmem:[%s4510_s0 + $0x8] sm:$0xff]  ;;  %v139_v6 = vld [vmem:[%s4513_s3 + $0x20] sm:$0xff]  ;;  %v137_v10 = vld [vmem:[%s4513_s3 + $0x10] sm:$0xff]  ;;  %s4459_s30 = sld [smem:[#allocation3]]  ;;  %vm3136_vm5 = vcmask 254976   ;;  %vm3142_vm6 = vcmask 517376  }
  0x12   :  { %3422 = vmatprep.subr.mxu1 %v140_v3  ;;  %3417 = vmatprep.subr.mxu0 %v38_v1  ;;  %v231_v5 = vld [vmem:[%s4513_s3 + $0x48] sm:$0xff]  ;;  %v230_v7 = vld [vmem:[%s4513_s3 + $0x40] sm:$0xff]  ;;  %v228_v11 = vld [vmem:[%s4513_s3 + $0x30] sm:$0xff] }
  0x13   :  { %3423 = vmatpush3.msra.mxu1 %v140_v3  ;;  %3418 = vmatpush3.msra.mxu0 %v38_v1  ;;  %v315_v12 = vld [vmem:[%s4513_s3 + $0x68] sm:$0xff]  ;;  %v3152_v13 = vld [vmem:[%s4514_s4] ss:$0 sm:$0xff]  ;;  %v313_v23 = vld [vmem:[%s4513_s3 + $0x58] sm:$0xff] }
  0x14   :  { %3420 = vmatmul.mubr.msk.f32.vlgmr.msra.gmra.mxu0 %vm45_vm0, %v37_v4  ;;  %3433 = vmatprep.subr.mxu0 %v231_v5  ;;  %v127_v17 = vld [vmem:[%s4511_s1] sm:$0xff]  ;;  %v128_v18 = vld [vmem:[%s4511_s1 + $0x8] sm:$0xff]  ;;  %v312_v24 = vld [vmem:[%s4513_s3 + $0x50] sm:$0xff] }
  0x15   :  { %3424 = vmatprep.subr.mxu1 %v139_v6  ;;  %3434 = vmatpush3.msra.mxu0 %v231_v5  ;;  %v314_v22 = vld [vmem:[%s4513_s3 + $0x60] sm:$0xff]  ;;  %v3945_v34 = vld [vmem:[%s4514_s4 + $0x18] ss:$0 sm:$0xff]  ;;  %v3950_v35 = vld [vmem:[%s4514_s4 + $0x19] ss:$0 sm:$0xff] }
  0x16   :  { %3425 = vmatpush3.msra.mxu1 %v139_v6  ;;  %3435 = vmatprep.subr.mxu0 %v230_v7  ;;  %v3158_v25 = vld [vmem:[%s4514_s4 + $0x2] ss:$0 sm:$0xff]  ;;  %v3155_v31 = vld [vmem:[%s4514_s4 + $0x1] ss:$0 sm:$0xff]  ;;  %v3161_v37 = vld [vmem:[%s4514_s4 + $0x3] ss:$0 sm:$0xff] }
  0x17   :  { %3426 = vmatprep.subr.mxu1 %v138_v8  ;;  %3436 = vmatpush3.msra.mxu0 %v230_v7  ;;  %v3984_v45 = vld [vmem:[%s4514_s4 + $0x1a] ss:$0 sm:$0xff]  ;;  %v4002_v50 = vld [vmem:[%s4514_s4 + $0x1b] ss:$0 sm:$0xff]  ;;  %v4023_v57 = vld [vmem:[%s4512_s2] sm:$0xff]  ;;  %p3040_p5 = scmp.ge.s32.totalorder %s3253_s5, 0 }
  0x18   :  { %3427 = vmatpush3.msra.mxu1 %v138_v8  ;;  %3437 = vmatprep.subr.mxu0 %v229_v9  ;;  %v4028_v58 = vld [vmem:[%s4512_s2 + $0x8] sm:$0xff]  ;;  %p3035_p6 = scmp.gt.s32.totalorder %s3253_s5, 0  ;;  %p3025_p7 = scmp.ge.s32.totalorder %s4459_s30, 0 }
  0x19   :  { %3428 = vmatprep.subr.mxu1 %v137_v10  ;;  %3438 = vmatpush3.msra.mxu0 %v229_v9  ;;  %s3041_s9 = scalar_select %p3040_p5, 1, 0 }
  0x1a   :  { %3429 = vmatpush3.msra.mxu1 %v137_v10  ;;  %3439 = vmatprep.subr.mxu0 %v228_v11  ;;  %s4518_s5 = smov (!%p3035_p6, %s3253_s5), 0  ;;  %p3021_p8 = scmp.gt.s32.totalorder %s4459_s30, 0 }
  0x1b   :  { %3440 = vmatpush3.msra.mxu0 %v228_v11  ;;  %3444 = vmatprep.subr.mxu1 %v315_v12  ;;  %s3042_s10 = scvt.s32.f32 %s3041_s9  ;;  %s3150_s16 = scalar_lea.vmem [#allocation2], %s4518_s5 }
  0x1c   :  { %s3026_s11 = scalar_select %p3025_p7, 1, 0 }
  0x1d   :  { %s3045_s12 = ssub.f32 1.0, %s3042_s10  ;;  %s4520_s30 = smov (!%p3021_p8, %s4459_s30), 0 }
  0x1e   :  { %s3027_s13 = scvt.s32.f32 %s3026_s11  ;;  %s3023_s19 = scalar_lea.vmem [#allocation2], %s4520_s30 }
  0x1f   :  { %s3810_s30 = smov 32  }
  0x20   :  { %s3030_s0 = ssub.f32 1.0, %s3027_s13 }
  0xd4   :  { %v3421_v14 = vpop.f32.mrf.mxu0 }
  0xd5   :  { %v124_v15 = vadd.f32 %v3421_v14, %v3152_v13 }
  0xd6   :  { %v118_v16 = vpop.f32.mrf.mxu0 }
  0xd7   :  { %v119_v19 = vadd.f32 %v3152_v13, %v118_v16  ;;  %v3901_v21 = vadd.f32 %v128_v18, %v124_v15 }
  0xd9   :  { %v3899_v20 = vadd.f32 %v127_v17, %v119_v19 }
  0xdb   :  { %3430 = vmatprep.mubr.msk.f32.mxu1 %vm146_vm1, %v3899_v20  ;;  %3441 = vmatprep.mubr.msk.f32.mxu0 %vm146_vm1, %v3899_v20 }
  0xdc   :  { %3431 = vmatmul.mubr.msk.f32.vlgmr.msra.gmra.mxu1 %vm146_vm1, %v3901_v21  ;;  %3442 = vmatmul.mubr.msk.f32.vlgmr.msra.gmra.mxu0 %vm146_vm1, %v3901_v21 }
  0xdd   :  { %3445 = vmatpush3.msra.mxu1 %v315_v12  ;;  %3452 = vmatprep.mubr.msk.f32.mxu1 %vm146_vm1, %v3899_v20 }
  0xde   :  { %3446 = vmatprep.subr.mxu1 %v314_v22 }
  0xdf   :  { %3447 = vmatpush3.msra.mxu1 %v314_v22 }
  0xe0   :  { %3448 = vmatprep.subr.mxu1 %v313_v23 }
  0xe1   :  { %3449 = vmatpush3.msra.mxu1 %v313_v23 }
  0xe2   :  { %3450 = vmatprep.subr.mxu1 %v312_v24 }
  0xe3   :  { %3451 = vmatpush3.msra.mxu1 %v312_v24 }
  0xe4   :  { %3453 = vmatmul.mubr.msk.f32.vlgmr.msra.gmra.mxu1 %vm146_vm1, %v3901_v21 }
 0x19c   :  { %v3432_v26 = vpop.f32.mrf.mxu1  ;;  %v3443_v27 = vpop.f32.mrf.mxu0 }
 0x19d   :  { %v3927_v28 = vadd.f32 %v3443_v27, %v3158_v25  ;;  %v3954_v36 = vadd.f32 %v3432_v26, %v3155_v31 }
 0x19e   :  { %v219_v29 = vpop.f32.mrf.mxu1  ;;  %v303_v30 = vpop.f32.mrf.mxu0 }
 0x19f   :  { %3455 = vmatprep.subr.msk.mxu0 %vm146_vm1, %v3927_v28  ;;  %v3934_v32 = vadd.f32 %v3155_v31, %v219_v29  ;;  %v3936_v33 = vadd.f32 %v3158_v25, %v303_v30  ;;  %3462 = vmatprep.subr.msk.mxu1 %vm146_vm1, %v3927_v28  ;;  %v401_v42 = vmul.f32 %v3945_v34, %v3954_v36 }
 0x1a0   :  { %3456 = vmatpush3.xpose.msk.msra.mxu0 %vm146_vm1, %v3927_v28  ;;  %3463 = vmatpush3.xpose.msk.msra.mxu1 %vm146_vm1, %v3927_v28  ;;  %v518_v43 = vmul.f32 %v3950_v35, %v3954_v36  ;;  %v791_v53 = vmul.f32 %v3984_v45, %v3954_v36 }
 0x1a1   :  { %3457 = vmatprep.subr.msk.mxu0 %vm146_vm1, %v3936_v33  ;;  %3464 = vmatprep.subr.msk.mxu1 %vm146_vm1, %v3936_v33  ;;  %v400_v38 = vmul.f32 %v3945_v34, %v3934_v32  ;;  %v517_v39 = vmul.f32 %v3950_v35, %v3934_v32  ;;  %v790_v48 = vmul.f32 %v3984_v45, %v3934_v32 }
 0x1a3   :  { %3459 = vmatprep.mubr.msk.f32.mxu0 %vm146_vm1, %v400_v38  ;;  %3466 = vmatprep.mubr.msk.f32.mxu1 %vm146_vm1, %v517_v39 }
 0x1a4   :  { %v3454_v40 = vpop.f32.mrf.mxu1  ;;  %3458 = vmatpush3.xpose.msk.msra.mxu0 %vm146_vm1, %v3936_v33  ;;  %3465 = vmatpush3.xpose.msk.msra.mxu1 %vm146_vm1, %v3936_v33 }
 0x1a5   :  { %v3969_v41 = vadd.f32 %v3454_v40, %v3161_v37  ;;  %3483 = vmatprep.subr.msk.mxu1 %vm146_vm1, %v3927_v28 }
 0x1a6   :  { %v387_v44 = vpop.f32.mrf.mxu1 }
 0x1a7   :  { %v3986_v46 = vadd.f32 %v3161_v37, %v387_v44  ;;  %v623_v47 = vmul.f32 %v3950_v35, %v3969_v41  ;;  %3460 = vmatmul.mubr.msk.f32.vlgmr.msra.gmra.mxu0 %vm146_vm1, %v401_v42  ;;  %3467 = vmatmul.mubr.msk.f32.vlgmr.msra.gmra.mxu1 %vm146_vm1, %v518_v43  ;;  %v4008_v51 = vmul.f32 %v3945_v34, %v3969_v41 }
 0x1a8   :  { %3484 = vmatpush3.xpose.msk.msra.mxu1 %vm146_vm1, %v3927_v28  ;;  %3487 = vmatprep.mubr.msk.f32.mxu1 %vm146_vm1, %v790_v48  ;;  %v1090_v52 = vmul.f32 %v4002_v50, %v3969_v41 }
 0x1a9   :  { %3469 = vmatprep.subr.mxu0 %v623_v47  ;;  %v622_v49 = vmul.f32 %v3950_v35, %v3986_v46  ;;  %3485 = vmatprep.subr.msk.mxu1 %vm146_vm1, %v3936_v33  ;;  %v1089_v54 = vmul.f32 %v4002_v50, %v3986_v46 }
 0x1aa   :  { %3470 = vmatpush3.msra.mxu0 %v623_v47 }
 0x1ab   :  { %3471 = vmatprep.subr.mxu0 %v622_v49 }
 0x1ac   :  { %3472 = vmatpush3.msra.mxu0 %v622_v49  ;;  %3486 = vmatpush3.xpose.msk.msra.mxu1 %vm146_vm1, %v3936_v33 }
 0x1ad   :  { %3476 = vmatprep.subr.mxu0 %v4008_v51  ;;  %3504 = vmatprep.subr.mxu1 %v1090_v52 }
 0x1af   :  { %3488 = vmatmul.mubr.msk.f32.vlgmr.msra.gmra.mxu1 %vm146_vm1, %v791_v53 }
 0x1b0   :  { %3505 = vmatpush3.msra.mxu1 %v1090_v52 }
 0x1b1   :  { %3506 = vmatprep.subr.mxu1 %v1089_v54 }
 0x1b2   :  { %3507 = vmatpush3.msra.mxu1 %v1089_v54 }
 0x267   :  { %v3461_v55 = vpop.f32.mrf.mxu0  ;;  %v3468_v56 = vpop.f32.mrf.mxu1 }
 0x268   :  { %v486_v63 = vadd.f32 %v3461_v55, %v4028_v58  ;;  %v597_v0 = vadd.f32 %v3468_v56, %v4028_v58 }
 0x269   :  { %v480_v59 = vpop.f32.mrf.mxu0  ;;  %v591_v60 = vpop.f32.mrf.mxu1 }
 0x26a   :  { %v481_v61 = vadd.f32 %v480_v59, %v4023_v57  ;;  %v592_v62 = vadd.f32 %v591_v60, %v4023_v57  ;;  %v603_v5 = vsel %vm45_vm0, %v597_v0, -inf  ;;  %v492_v6 = vsel %vm45_vm0, %v486_v63, -inf }
 0x26c   :  { %v600_v1 = vsel %vm45_vm0, %v592_v62, -inf  ;;  %v489_v2 = vsel %vm45_vm0, %v481_v61, -inf }
 0x26d   :  { %601 = vmax.xlane.f32.xlu0 %v600_v1  ;;  %490 = vmax.xlane.f32.xlu1 %v489_v2 }
 0x26f   :  { %v3489_v3 = vpop.f32.mrf.mxu1 }
 0x270   :  { %v870_v4 = vadd.f32 %v3489_v3, %v4028_v58 }
 0x271   :  { %v864_v7 = vpop.f32.mrf.mxu1  ;;  %604 = vmax.xlane.f32.xlu0 %v603_v5  ;;  %493 = vmax.xlane.f32.xlu1 %v492_v6  ;;  %v511_v5 = vmul.f32 %v3945_v34, %v3986_v46 }
 0x272   :  { %v865_v8 = vadd.f32 %v864_v7, %v4023_v57  ;;  %v876_v10 = vsel %vm45_vm0, %v870_v4, -inf }
 0x274   :  { %v873_v9 = vsel %vm45_vm0, %v865_v8, -inf }
 0x275   :  { %874 = vmax.xlane.f32.xlu0 %v873_v9  ;;  %877 = vmax.xlane.f32.xlu1 %v876_v10 }
 0x2f6   :  { %v602_v11 = vpop.xlane.xlu0 %601  ;;  %v491_v12 = vpop.xlane.xlu1 %490 }
 0x2f7   :  { %v606_v13 = vsub.f32 %v592_v62, %v602_v11  ;;  %v495_v14 = vsub.f32 %v481_v61, %v491_v12  ;;  %v895_v11 = vmul.f32 %v3984_v45, %v3986_v46  ;;  %v984_v12 = vmul.f32 %v4002_v50, %v3934_v32 }
 0x2f9   :  { %v608_v15 = vmul.f32 1.442695, %v606_v13  ;;  %v497_v16 = vmul.f32 1.442695, %v495_v14 }
 0x2fa   :  { %v605_v17 = vpop.xlane.xlu0 %604  ;;  %v494_v18 = vpop.xlane.xlu1 %493 }
 0x2fb   :  { %3708 = vpow2.f32 %v608_v15  ;;  %v607_v19 = vsub.f32 %v597_v0, %v605_v17  ;;  %v496_v22 = vsub.f32 %v486_v63, %v494_v18 }
 0x2fc   :  { %3710 = vpow2.f32 %v497_v16 }
 0x2fd   :  { %v610_v23 = vmul.f32 1.442695, %v607_v19  ;;  %v499_v24 = vmul.f32 1.442695, %v496_v22 }
 0x2fe   :  { %v875_v25 = vpop.xlane.xlu0 %874  ;;  %v878_v26 = vpop.xlane.xlu1 %877 }
 0x2ff   :  { %3712 = vpow2.f32 %v610_v23  ;;  %v879_v27 = vsub.f32 %v865_v8, %v875_v25  ;;  %v880_v29 = vsub.f32 %v870_v4, %v878_v26  ;;  %v896_v8 = vmul.f32 %v3984_v45, %v3969_v41 }
 0x300   :  { %3714 = vpow2.f32 %v499_v24  ;;  %v985_v41 = vmul.f32 %v4002_v50, %v3954_v36 }
 0x301   :  { %v881_v30 = vmul.f32 1.442695, %v879_v27  ;;  %v883_v31 = vmul.f32 1.442695, %v880_v29 }
 0x303   :  { %3716 = vpow2.f32 %v881_v30 }
 0x304   :  { %3718 = vpow2.f32 %v883_v31 }
 0x308   :  { %v3709_v37 = vpop.eup %3708 }
 0x309   :  { %v612_v38 = vsel %vm45_vm0, %v3709_v37, 0.0  ;;  %v3711_v39 = vpop.eup %3710 }
 0x30a   :  { %613 = vadd.xlane.f32.xlu0 %v612_v38  ;;  %v501_v43 = vsel %vm45_vm0, %v3711_v39, 0.0 }
 0x30c   :  { %v3713_v40 = vpop.eup %3712 }
 0x30d   :  { %v615_v42 = vsel %vm45_vm0, %v3713_v40, 0.0  ;;  %v3715_v44 = vpop.eup %3714 }
 0x30e   :  { %616 = vadd.xlane.f32.xlu1 %v615_v42  ;;  %502 = vadd.xlane.f32.xlu0 %v501_v43  ;;  %v504_v49 = vsel %vm45_vm0, %v3715_v44, 0.0  ;;  %v1177_v43 = vld [vmem:[%s4513_s3 + $0x88] sm:$0xff] }
 0x30f   :  { %3511 = vmatprep.subr.mxu1 %v1177_v43 }
 0x310   :  { %v3717_v47 = vpop.eup %3716 }
 0x311   :  { %v885_v48 = vsel %vm45_vm0, %v3717_v47, 0.0  ;;  %v3719_v52 = vpop.eup %3718 }
 0x312   :  { %886 = vadd.xlane.f32.xlu0 %v885_v48  ;;  %505 = vadd.xlane.f32.xlu1 %v504_v49  ;;  %v888_v53 = vsel %vm45_vm0, %v3719_v52, 0.0 }
 0x316   :  { %889 = vadd.xlane.f32.xlu1 %v888_v53 }
 0x393   :  { %v614_v54 = vpop.xlane.xlu0 %613 }
 0x394   :  { %3720 = vrcp.f32 %v614_v54  ;;  %v1176_v54 = vld [vmem:[%s4513_s3 + $0x80] sm:$0xff] }
 0x397   :  { %v503_v55 = vpop.xlane.xlu0 %502  ;;  %v617_v56 = vpop.xlane.xlu1 %616 }
 0x398   :  { %3722 = vrcp.f32 %v503_v55  ;;  %v1175_v55 = vld [vmem:[%s4513_s3 + $0x78] sm:$0xff] }
 0x399   :  { %3724 = vrcp.f32 %v617_v56  ;;  %v1174_v56 = vld [vmem:[%s4513_s3 + $0x70] sm:$0xff] }
 0x39b   :  { %v887_v59 = vpop.xlane.xlu0 %886  ;;  %v506_v60 = vpop.xlane.xlu1 %505 }
 0x39c   :  { %3726 = vrcp.f32 %v887_v59 }
 0x39d   :  { %3728 = vrcp.f32 %v506_v60 }
 0x39f   :  { %v890_v61 = vpop.xlane.xlu1 %889 }
 0x3a0   :  { %3730 = vrcp.f32 %v890_v61 }
 0x3a1   :  { %v3721_v62 = vpop.eup %3720 }
 0x3a2   :  { %v619_v63 = vmul.f32 %v3721_v62, %v3709_v37 }
 0x3a4   :  { %3473 = vmatprep.mubr.msk.f32.mxu0 %vm45_vm0, %v619_v63  ;;  %v3192_v63 = vld [vmem:[%s4514_s4 + $0x4] ss:$0 sm:$0xff] }
 0x3a5   :  { %v3723_v0 = vpop.eup %3722 }
 0x3a6   :  { %v3725_v1 = vpop.eup %3724  ;;  %v508_v2 = vmul.f32 %v3723_v0, %v3711_v39 }
 0x3a7   :  { %v621_v3 = vmul.f32 %v3725_v1, %v3713_v40 }
 0x3a9   :  { %v3727_v4 = vpop.eup %3726  ;;  %3474 = vmatmul.mubr.msk.f32.vlgmr.msra.gmra.mxu0 %vm45_vm0, %v621_v3 }
 0x3aa   :  { %v3729_v6 = vpop.eup %3728  ;;  %3477 = vmatpush3.msra.mxu0 %v4008_v51  ;;  %3480 = vmatprep.mubr.msk.f32.mxu0 %vm45_vm0, %v508_v2  ;;  %v892_v7 = vmul.f32 %v3727_v4, %v3717_v47 }
 0x3ab   :  { %3478 = vmatprep.subr.mxu0 %v511_v5  ;;  %v510_v9 = vmul.f32 %v3729_v6, %v3715_v44 }
 0x3ac   :  { %3479 = vmatpush3.msra.mxu0 %v511_v5 }
 0x3ad   :  { %v3731_v10 = vpop.eup %3730  ;;  %3490 = vmatprep.subr.mxu0 %v896_v8  ;;  %3481 = vmatmul.mubr.msk.f32.vlgmr.msra.gmra.mxu0 %vm45_vm0, %v510_v9 }
 0x3ae   :  { %3491 = vmatpush3.msra.mxu0 %v896_v8  ;;  %3494 = vmatprep.mubr.msk.f32.mxu0 %vm45_vm0, %v892_v7  ;;  %v894_v51 = vmul.f32 %v3731_v10, %v3719_v52 }
 0x3af   :  { %3492 = vmatprep.subr.mxu0 %v895_v11 }
 0x3b0   :  { %3493 = vmatpush3.msra.mxu0 %v895_v11 }
 0x3b1   :  { %3497 = vmatprep.subr.msk.mxu0 %vm146_vm1, %v3927_v28  ;;  %3495 = vmatmul.mubr.msk.f32.vlgmr.msra.gmra.mxu0 %vm45_vm0, %v894_v51 }
 0x3b2   :  { %3498 = vmatpush3.xpose.msk.msra.mxu0 %vm146_vm1, %v3927_v28  ;;  %3501 = vmatprep.mubr.msk.f32.mxu0 %vm146_vm1, %v984_v12 }
 0x3b3   :  { %3499 = vmatprep.subr.msk.mxu0 %vm146_vm1, %v3936_v33 }
 0x3b6   :  { %3500 = vmatpush3.xpose.msk.msra.mxu0 %vm146_vm1, %v3936_v33 }
 0x3b9   :  { %3502 = vmatmul.mubr.msk.f32.vlgmr.msra.gmra.mxu0 %vm146_vm1, %v985_v41 }
 0x469   :  { %v3475_v32 = vpop.f32.mrf.mxu0 }
 0x46b   :  { %v696_v46 = vpop.f32.mrf.mxu0 }
 0x46d   :  { %v3482_v13 = vpop.f32.mrf.mxu0 }
 0x46e   :  { %v783_v14 = vadd.f32 %v3482_v13, %v3475_v32  ;;  %v1309_v13 = vld [vmem:[%s4513_s3 + $0xa0] sm:$0xff] }
 0x46f   :  { %v777_v15 = vpop.f32.mrf.mxu0 }
 0x470   :  { %v778_v16 = vadd.f32 %v777_v15, %v696_v46  ;;  %v1307_v15 = vld [vmem:[%s4513_s3 + $0x90] sm:$0xff] }
 0x471   :  { %v3496_v28 = vpop.f32.mrf.mxu0 }
 0x472   :  { %v979_v17 = vadd.f32 %v3496_v28, %v783_v14  ;;  %v1308_v14 = vld [vmem:[%s4513_s3 + $0x98] sm:$0xff]  ;;  %v1405_v28 = vld [vmem:[%s4513_s3 + $0xe0] sm:$0xff] }
 0x473   :  { %v969_v18 = vpop.f32.mrf.mxu0 }
 0x474   :  { %v978_v19 = vadd.f32 %v969_v18, %v778_v16  ;;  %v1406_v16 = vld [vmem:[%s4513_s3 + $0xe8] sm:$0xff]  ;;  %v1403_v18 = vld [vmem:[%s4513_s3 + $0xd0] sm:$0xff] }
 0x479   :  { %v3503_v22 = vpop.f32.mrf.mxu0 }
 0x47a   :  { %v1064_v23 = vadd.f32 %v3503_v22, %v4028_v58 }
 0x47b   :  { %v1058_v24 = vpop.f32.mrf.mxu0 }
 0x47c   :  { %v1059_v33 = vadd.f32 %v1058_v24, %v4023_v57  ;;  %v1070_v36 = vsel %vm45_vm0, %v1064_v23, -inf }
 0x47d   :  { %1071 = vmax.xlane.f32.xlu1 %v1070_v36 }
 0x47e   :  { %v1067_v25 = vsel %vm45_vm0, %v1059_v33, -inf }
 0x47f   :  { %1068 = vmax.xlane.f32.xlu0 %v1067_v25 }
 0x506   :  { %v1072_v26 = vpop.xlane.xlu1 %1071 }
 0x507   :  { %v1074_v27 = vsub.f32 %v1064_v23, %v1072_v26  ;;  %v3195_v26 = vld [vmem:[%s4514_s4 + $0x7] ss:$0 sm:$0xff] }
 0x508   :  { %v1069_v29 = vpop.xlane.xlu0 %1068 }
 0x509   :  { %v1077_v30 = vmul.f32 1.442695, %v1074_v27  ;;  %v1073_v31 = vsub.f32 %v1059_v33, %v1069_v29 }
 0x50b   :  { %3732 = vpow2.f32 %v1077_v30  ;;  %v1075_v37 = vmul.f32 1.442695, %v1073_v31 }
 0x50d   :  { %3734 = vpow2.f32 %v1075_v37  ;;  %v3196_v37 = vld [vmem:[%s4514_s4 + $0x8] ss:$0 sm:$0xff] }
 0x518   :  { %v3733_v38 = vpop.eup %3732 }
 0x519   :  { %v1082_v39 = vsel %vm45_vm0, %v3733_v38, 0.0 }
 0x51a   :  { %v3735_v40 = vpop.eup %3734  ;;  %1083 = vadd.xlane.f32.xlu1 %v1082_v39 }
 0x51b   :  { %v1079_v42 = vsel %vm45_vm0, %v3735_v40, 0.0 }
 0x51c   :  { %1080 = vadd.xlane.f32.xlu0 %v1079_v42  ;;  %v1402_v42 = vld [vmem:[%s4513_s3 + $0xc8] sm:$0xff] }
 0x5a3   :  { %v1084_v44 = vpop.xlane.xlu1 %1083 }
 0x5a4   :  { %3736 = vrcp.f32 %v1084_v44  ;;  %v1400_v44 = vld [vmem:[%s4513_s3 + $0xb8] sm:$0xff] }
 0x5a5   :  { %v1081_v47 = vpop.xlane.xlu0 %1080 }
 0x5a6   :  { %3738 = vrcp.f32 %v1081_v47  ;;  %v1399_v47 = vld [vmem:[%s4513_s3 + $0xb0] sm:$0xff] }
 0x5b1   :  { %v3737_v48 = vpop.eup %3736 }
 0x5b2   :  { %v1088_v53 = vmul.f32 %v3737_v48, %v3733_v38  ;;  %v3197_v48 = vld [vmem:[%s4514_s4 + $0x5] ss:$0 sm:$0xff] }
 0x5b3   :  { %v3739_v49 = vpop.eup %3738 }
 0x5b4   :  { %v1086_v52 = vmul.f32 %v3739_v49, %v3735_v40 }
 0x5b6   :  { %3508 = vmatprep.mubr.msk.f32.mxu1 %vm45_vm0, %v1086_v52 }
 0x5b7   :  { %3509 = vmatmul.mubr.msk.f32.vlgmr.msra.gmra.mxu1 %vm45_vm0, %v1088_v53 }
 0x5b8   :  { %3512 = vmatpush3.msra.mxu1 %v1177_v43  ;;  %v1401_v43 = vld [vmem:[%s4513_s3 + $0xc0] sm:$0xff] }
 0x5b9   :  { %3513 = vmatprep.subr.mxu1 %v1176_v54 }
 0x5ba   :  { %3514 = vmatpush3.msra.mxu1 %v1176_v54 }
 0x5bb   :  { %3515 = vmatprep.subr.mxu1 %v1175_v55 }
 0x5bc   :  { %3516 = vmatpush3.msra.mxu1 %v1175_v55 }
 0x5bd   :  { %3517 = vmatprep.subr.mxu1 %v1174_v56 }
 0x5be   :  { %3518 = vmatpush3.msra.mxu1 %v1174_v56 }
 0x5bf   :  { %3533 = vmatprep.subr.mxu1 %v1406_v16 }
 0x677   :  { %v3510_v59 = vpop.f32.mrf.mxu1 }
 0x678   :  { %v1173_v62 = vadd.f32 %v3510_v59, %v979_v17  ;;  %v1404_v17 = vld [vmem:[%s4513_s3 + $0xd8] sm:$0xff]  ;;  %v3200_v59 = vld [vmem:[%s4514_s4 + $0x6] ss:$0 sm:$0xff] }
 0x679   :  { %v1163_v60 = vpop.f32.mrf.mxu1 }
 0x67a   :  { %v1172_v61 = vadd.f32 %v1163_v60, %v978_v19 }
 0x67c   :  { %3519 = vmatprep.mubr.msk.f32.mxu1 %vm146_vm1, %v1172_v61 }
 0x67d   :  { %3520 = vmatmul.mubr.msk.f32.vlgmr.msra.gmra.mxu1 %vm146_vm1, %v1173_v62 }
 0x67e   :  { %3534 = vmatpush3.msra.mxu1 %v1406_v16  ;;  %v1629_v16 = vld [vmem:[%s4513_s3 + $0x128] sm:$0xff] }
 0x67f   :  { %3535 = vmatprep.subr.mxu1 %v1405_v28 }
 0x680   :  { %3536 = vmatpush3.msra.mxu1 %v1405_v28 }
 0x681   :  { %3537 = vmatprep.subr.mxu1 %v1404_v17 }
 0x682   :  { %3538 = vmatpush3.msra.mxu1 %v1404_v17 }
 0x683   :  { %3539 = vmatprep.subr.mxu1 %v1403_v18 }
 0x684   :  { %3540 = vmatpush3.msra.mxu1 %v1403_v18 }
 0x685   :  { %3541 = vmatprep.subr.mxu1 %v1402_v42 }
 0x686   :  { %3542 = vmatpush3.msra.mxu1 %v1402_v42 }
 0x687   :  { %3543 = vmatprep.subr.mxu1 %v1401_v43 }
 0x688   :  { %3544 = vmatpush3.msra.mxu1 %v1401_v43 }
 0x689   :  { %3545 = vmatprep.subr.mxu1 %v1400_v44 }
 0x68a   :  { %3546 = vmatpush3.msra.mxu1 %v1400_v44  ;;  %v3205_v44 = vld [vmem:[%s4514_s4 + $0xb] ss:$0 sm:$0xff] }
 0x68b   :  { %3547 = vmatprep.subr.mxu1 %v1399_v47 }
 0x68c   :  { %3548 = vmatpush3.msra.mxu1 %v1399_v47 }
 0x73d   :  { %v3521_v0 = vpop.f32.mrf.mxu1 }
 0x73e   :  { %v1261_v1 = vadd.f32 %v3521_v0, %v3192_v63 }
 0x73f   :  { %v1255_v2 = vpop.f32.mrf.mxu1 }
 0x740   :  { %v1256_v3 = vadd.f32 %v3192_v63, %v1255_v2  ;;  %v1265_v4 = vadd.f32 %v1261_v1, %v3901_v21 }
 0x742   :  { %v1271_v5 = vsel %vm146_vm1, %v1265_v4, 0.0  ;;  %v1264_v6 = vadd.f32 %v1256_v3, %v3899_v20  ;;  %v1310_v20 = vld [vmem:[%s4513_s3 + $0xa8] sm:$0xff] }
 0x743   :  { %1272 = vadd.xlane.f32.xlu1 %v1271_v5  ;;  %3522 = vmatprep.subr.mxu0 %v1310_v20 }
 0x744   :  { %v1268_v7 = vsel %vm146_vm1, %v1264_v6, 0.0  ;;  %3523 = vmatpush3.msra.mxu0 %v1310_v20  ;;  %v1537_v20 = vld [vmem:[%s4513_s3 + $0xf8] sm:$0xff] }
 0x745   :  { %1269 = vadd.xlane.f32.xlu0 %v1268_v7  ;;  %3524 = vmatprep.subr.mxu0 %v1309_v13 }
 0x746   :  { %3525 = vmatpush3.msra.mxu0 %v1309_v13  ;;  %v1711_v13 = vld [vmem:[%s4513_s3 + $0x138] sm:$0xff] }
 0x747   :  { %3526 = vmatprep.subr.mxu0 %v1308_v14 }
 0x748   :  { %3527 = vmatpush3.msra.mxu0 %v1308_v14  ;;  %v1536_v14 = vld [vmem:[%s4513_s3 + $0xf0] sm:$0xff] }
 0x749   :  { %3528 = vmatprep.subr.mxu0 %v1307_v15 }
 0x74a   :  { %3529 = vmatpush3.msra.mxu0 %v1307_v15  ;;  %v1710_v15 = vld [vmem:[%s4513_s3 + $0x130] sm:$0xff] }
 0x7cc   :  { %v1273_v8 = vpop.xlane.xlu1 %1272 }
 0x7cd   :  { %v1276_v9 = vmul.f32 0.03125, %v1273_v8 }
 0x7ce   :  { %v1270_v10 = vpop.xlane.xlu0 %1269 }
 0x7cf   :  { %v1278_v11 = vsub.f32 %v1265_v4, %v1276_v9  ;;  %v1275_v51 = vmul.f32 0.03125, %v1270_v10 }
 0x7d1   :  { %v1277_v12 = vsub.f32 %v1264_v6, %v1275_v51  ;;  %v1280_v41 = vmul.f32 %v1278_v11, %v1278_v11 }
 0x7d3   :  { %v1284_v32 = vsel %vm146_vm1, %v1280_v41, 0.0  ;;  %v1279_v46 = vmul.f32 %v1277_v12, %v1277_v12  ;;  %v1539_v41 = vld [vmem:[%s4513_s3 + $0x108] sm:$0xff] }
 0x7d4   :  { %1285 = vadd.xlane.f32.xlu1 %v1284_v32  ;;  %v1713_v32 = vld [vmem:[%s4513_s3 + $0x148] sm:$0xff]  ;;  %3552 = vmatprep.subr.mxu0 %v1539_v41 }
 0x7d5   :  { %v1281_v21 = vsel %vm146_vm1, %v1279_v46, 0.0  ;;  %v1538_v46 = vld [vmem:[%s4513_s3 + $0x100] sm:$0xff]  ;;  %3574 = vmatprep.subr.mxu1 %v1713_v32 }
 0x7d6   :  { %1282 = vadd.xlane.f32.xlu0 %v1281_v21  ;;  %v1712_v21 = vld [vmem:[%s4513_s3 + $0x140] sm:$0xff] }
 0x85d   :  { %v1286_v19 = vpop.xlane.xlu1 %1285 }
 0x85e   :  { %v1288_v22 = vmul.f32 0.03125, %v1286_v19 }
 0x85f   :  { %v1283_v23 = vpop.xlane.xlu0 %1282 }
 0x860   :  { %v1290_v24 = vadd.f32 1e-05, %v1288_v22  ;;  %v1287_v33 = vmul.f32 0.03125, %v1283_v23 }
 0x862   :  { %3740 = vrsqrt.f32 %v1290_v24  ;;  %v1289_v36 = vadd.f32 1e-05, %v1287_v33  ;;  %v3203_v33 = vld [vmem:[%s4514_s4 + $0x9] ss:$0 sm:$0xff] }
 0x864   :  { %3742 = vrsqrt.f32 %v1289_v36 }
 0x86f   :  { %v3741_v25 = vpop.eup %3740 }
 0x870   :  { %v1294_v27 = vmul.f32 %v3741_v25, %v1278_v11 }
 0x871   :  { %v3743_v29 = vpop.eup %3742 }
 0x872   :  { %v1293_v30 = vmul.f32 %v3743_v29, %v1277_v12  ;;  %v1300_v31 = vmul.f32 %v3195_v26, %v1294_v27  ;;  %v3204_v29 = vld [vmem:[%s4514_s4 + $0xa] ss:$0 sm:$0xff] }
 0x874   :  { %v1299_v38 = vmul.f32 %v3195_v26, %v1293_v30  ;;  %v1306_v40 = vadd.f32 %v3196_v37, %v1300_v31 }
 0x876   :  { %v1305_v39 = vadd.f32 %v3196_v37, %v1299_v38  ;;  %v1628_v38 = vld [vmem:[%s4513_s3 + $0x120] sm:$0xff] }
 0x878   :  { %3530 = vmatprep.mubr.msk.f32.mxu0 %vm146_vm1, %v1305_v39 }
 0x879   :  { %3531 = vmatmul.mubr.msk.f32.vlgmr.msra.gmra.mxu0 %vm146_vm1, %v1306_v40 }
 0x87a   :  { %3553 = vmatpush3.msra.mxu0 %v1539_v41 }
 0x87b   :  { %3554 = vmatprep.subr.mxu0 %v1538_v46 }
 0x87c   :  { %3555 = vmatpush3.msra.mxu0 %v1538_v46 }
 0x87d   :  { %3556 = vmatprep.subr.mxu0 %v1537_v20 }
 0x87e   :  { %3557 = vmatpush3.msra.mxu0 %v1537_v20 }
 0x87f   :  { %3558 = vmatprep.subr.mxu0 %v1536_v14 }
 0x880   :  { %3559 = vmatpush3.msra.mxu0 %v1536_v14 }
 0x881   :  { %3563 = vmatprep.subr.mxu0 %v1629_v16 }
 0x939   :  { %v3532_v49 = vpop.f32.mrf.mxu0 }
 0x93a   :  { %v1394_v52 = vadd.f32 %v3532_v49, %v3197_v48 }
 0x93b   :  { %v1388_v53 = vpop.f32.mrf.mxu0 }
 0x93c   :  { %v1389_v54 = vadd.f32 %v3197_v48, %v1388_v53  ;;  %v1398_v56 = vmax.f32 %v1394_v52, 0.0  ;;  %v3208_v48 = vld [vmem:[%s4514_s4 + $0xc] ss:$0 sm:$0xff] }
 0x93e   :  { %v1397_v55 = vmax.f32 %v1389_v54, 0.0  ;;  %v3211_v54 = vld [vmem:[%s4514_s4 + $0xd] ss:$0 sm:$0xff] }
 0x940   :  { %3549 = vmatprep.mubr.msk.f32.mxu1 %vm1412_vm2, %v1397_v55 }
 0x941   :  { %3550 = vmatmul.mubr.msk.f32.vlgmr.msra.gmra.mxu1 %vm1412_vm2, %v1398_v56 }
 0x942   :  { %3575 = vmatpush3.msra.mxu1 %v1713_v32 }
 0x943   :  { %3576 = vmatprep.subr.mxu1 %v1712_v21 }
 0x944   :  { %3577 = vmatpush3.msra.mxu1 %v1712_v21 }
 0x945   :  { %3578 = vmatprep.subr.mxu1 %v1711_v13 }
 0x946   :  { %3579 = vmatpush3.msra.mxu1 %v1711_v13 }
 0x947   :  { %3580 = vmatprep.subr.mxu1 %v1710_v15 }
 0x948   :  { %3581 = vmatpush3.msra.mxu1 %v1710_v15 }
 0xa01   :  { %v3551_v60 = vpop.f32.mrf.mxu1 }
 0xa02   :  { %v1491_v61 = vadd.f32 %v3551_v60, %v3200_v59 }
 0xa03   :  { %v1485_v62 = vpop.f32.mrf.mxu1 }
 0xa04   :  { %v1486_v63 = vadd.f32 %v3200_v59, %v1485_v62  ;;  %v1495_v0 = vadd.f32 %v1491_v61, %v1306_v40  ;;  %v1626_v40 = vld [vmem:[%s4513_s3 + $0x110] sm:$0xff] }
 0xa06   :  { %v1501_v1 = vsel %vm146_vm1, %v1495_v0, 0.0  ;;  %v1494_v2 = vadd.f32 %v1486_v63, %v1305_v39  ;;  %v1627_v39 = vld [vmem:[%s4513_s3 + $0x118] sm:$0xff] }
 0xa07   :  { %1502 = vadd.xlane.f32.xlu1 %v1501_v1 }
 0xa08   :  { %v1498_v3 = vsel %vm146_vm1, %v1494_v2, 0.0 }
 0xa09   :  { %1499 = vadd.xlane.f32.xlu0 %v1498_v3 }
 0xa90   :  { %v1503_v4 = vpop.xlane.xlu1 %1502 }
 0xa91   :  { %v1505_v5 = vmul.f32 0.03125, %v1503_v4 }
 0xa92   :  { %v1500_v6 = vpop.xlane.xlu0 %1499 }
 0xa93   :  { %v1507_v7 = vsub.f32 %v1495_v0, %v1505_v5  ;;  %v1504_v8 = vmul.f32 0.03125, %v1500_v6 }
 0xa95   :  { %v1506_v9 = vsub.f32 %v1494_v2, %v1504_v8  ;;  %v1509_v10 = vmul.f32 %v1507_v7, %v1507_v7 }
 0xa97   :  { %v1513_v11 = vsel %vm146_vm1, %v1509_v10, 0.0  ;;  %v1508_v51 = vmul.f32 %v1506_v9, %v1506_v9 }
 0xa98   :  { %1514 = vadd.xlane.f32.xlu1 %v1513_v11 }
 0xa99   :  { %v1510_v12 = vsel %vm146_vm1, %v1508_v51, 0.0 }
 0xa9a   :  { %1511 = vadd.xlane.f32.xlu0 %v1510_v12 }
 0xb21   :  { %v1515_v28 = vpop.xlane.xlu1 %1514 }
 0xb22   :  { %v1517_v17 = vmul.f32 0.03125, %v1515_v28 }
 0xb23   :  { %v1512_v18 = vpop.xlane.xlu0 %1511 }
 0xb24   :  { %v1519_v19 = vadd.f32 1e-05, %v1517_v17  ;;  %v1516_v22 = vmul.f32 0.03125, %v1512_v18 }
 0xb26   :  { %3744 = vrsqrt.f32 %v1519_v19  ;;  %v1518_v23 = vadd.f32 1e-05, %v1516_v22 }
 0xb28   :  { %3746 = vrsqrt.f32 %v1518_v23 }
 0xb33   :  { %v3745_v24 = vpop.eup %3744 }
 0xb34   :  { %v1523_v36 = vmul.f32 %v3745_v24, %v1507_v7 }
 0xb35   :  { %v3747_v25 = vpop.eup %3746 }
 0xb36   :  { %v1522_v26 = vmul.f32 %v3747_v25, %v1506_v9  ;;  %v1529_v27 = vmul.f32 %v3203_v33, %v1523_v36 }
 0xb38   :  { %v1528_v30 = vmul.f32 %v3203_v33, %v1522_v26  ;;  %v4197_v37 = vadd.f32 %v3204_v29, %v1529_v27 }
 0xb3a   :  { %v4195_v31 = vadd.f32 %v3204_v29, %v1528_v30 }
 0xb3c   :  { %3560 = vmatprep.mubr.msk.f32.mxu0 %vm146_vm1, %v4195_v31  ;;  %3582 = vmatprep.mubr.msk.f32.mxu1 %vm146_vm1, %v4195_v31 }
 0xb3d   :  { %3561 = vmatmul.mubr.msk.f32.vlgmr.msra.gmra.mxu0 %vm146_vm1, %v4197_v37  ;;  %3583 = vmatmul.mubr.msk.f32.vlgmr.msra.gmra.mxu1 %vm146_vm1, %v4197_v37 }
 0xb3e   :  { %3564 = vmatpush3.msra.mxu0 %v1629_v16  ;;  %3571 = vmatprep.mubr.msk.f32.mxu0 %vm146_vm1, %v4195_v31 }
 0xb3f   :  { %3565 = vmatprep.subr.mxu0 %v1628_v38 }
 0xb40   :  { %3566 = vmatpush3.msra.mxu0 %v1628_v38 }
 0xb41   :  { %3567 = vmatprep.subr.mxu0 %v1627_v39 }
 0xb42   :  { %3568 = vmatpush3.msra.mxu0 %v1627_v39 }
 0xb43   :  { %3569 = vmatprep.subr.mxu0 %v1626_v40 }
 0xb44   :  { %3570 = vmatpush3.msra.mxu0 %v1626_v40 }
 0xb45   :  { %3572 = vmatmul.mubr.msk.f32.vlgmr.msra.gmra.mxu0 %vm146_vm1, %v4197_v37 }
 0xbfd   :  { %v3562_v42 = vpop.f32.mrf.mxu0  ;;  %v3584_v53 = vpop.f32.mrf.mxu1 }
 0xbfe   :  { %v4239_v60 = vadd.f32 %v3584_v53, %v3211_v54  ;;  %v4251_v63 = vadd.f32 %v3562_v42, %v3205_v44 }
 0xbff   :  { %v1617_v43 = vpop.f32.mrf.mxu0  ;;  %v1785_v62 = vpop.f32.mrf.mxu1 }
 0xc00   :  { %v4223_v47 = vadd.f32 %v3205_v44, %v1617_v43  ;;  %v4257_v0 = vadd.f32 %v3211_v54, %v1785_v62  ;;  %v2013_v1 = vmul.f32 %v3950_v35, %v4239_v60  ;;  %v1795_v2 = vmul.f32 %v3945_v34, %v4251_v63 }
 0xc01   :  { %v1908_v3 = vmul.f32 %v3950_v35, %v4251_v63  ;;  %v4282_v6 = vmul.f32 %v3945_v34, %v4239_v60  ;;  %v2177_v7 = vmul.f32 %v3984_v45, %v4251_v63 }
 0xc02   :  { %v1794_v49 = vmul.f32 %v3945_v34, %v4223_v47  ;;  %v1907_v52 = vmul.f32 %v3950_v35, %v4223_v47  ;;  %v2176_v4 = vmul.f32 %v3984_v45, %v4223_v47  ;;  %v2012_v5 = vmul.f32 %v3950_v35, %v4257_v0 }
 0xc03   :  { %v2472_v35 = vmul.f32 %v4002_v50, %v4239_v60  ;;  %v2471_v34 = vmul.f32 %v4002_v50, %v4257_v0 }
 0xc04   :  { %3589 = vmatprep.mubr.msk.f32.mxu0 %vm146_vm1, %v1794_v49  ;;  %3596 = vmatprep.mubr.msk.f32.mxu1 %vm146_vm1, %v1907_v52 }
 0xc05   :  { %v3573_v55 = vpop.f32.mrf.mxu0 }
 0xc06   :  { %v4237_v56 = vadd.f32 %v3573_v55, %v3208_v48 }
 0xc07   :  { %v1701_v59 = vpop.f32.mrf.mxu0 }
 0xc08   :  { %v4241_v61 = vadd.f32 %v3208_v48, %v1701_v59  ;;  %3585 = vmatprep.subr.msk.mxu0 %vm146_vm1, %v4237_v56  ;;  %3592 = vmatprep.subr.msk.mxu1 %vm146_vm1, %v4237_v56 }
 0xc09   :  { %3586 = vmatpush3.xpose.msk.msra.mxu0 %vm146_vm1, %v4237_v56  ;;  %3593 = vmatpush3.xpose.msk.msra.mxu1 %vm146_vm1, %v4237_v56 }
 0xc0a   :  { %3587 = vmatprep.subr.msk.mxu0 %vm146_vm1, %v4241_v61  ;;  %3594 = vmatprep.subr.msk.mxu1 %vm146_vm1, %v4241_v61 }
 0xc0d   :  { %3588 = vmatpush3.xpose.msk.msra.mxu0 %vm146_vm1, %v4241_v61  ;;  %3595 = vmatpush3.xpose.msk.msra.mxu1 %vm146_vm1, %v4241_v61 }
 0xc0e   :  { %3599 = vmatprep.subr.mxu0 %v2013_v1  ;;  %3613 = vmatprep.subr.msk.mxu1 %vm146_vm1, %v4237_v56 }
 0xc10   :  { %3590 = vmatmul.mubr.msk.f32.vlgmr.msra.gmra.mxu0 %vm146_vm1, %v1795_v2  ;;  %3597 = vmatmul.mubr.msk.f32.vlgmr.msra.gmra.mxu1 %vm146_vm1, %v1908_v3 }
 0xc11   :  { %3600 = vmatpush3.msra.mxu0 %v2013_v1  ;;  %3614 = vmatpush3.xpose.msk.msra.mxu1 %vm146_vm1, %v4237_v56 }
 0xc12   :  { %3617 = vmatprep.mubr.msk.f32.mxu1 %vm146_vm1, %v2176_v4  ;;  %3601 = vmatprep.subr.mxu0 %v2012_v5 }
 0xc13   :  { %3615 = vmatprep.subr.msk.mxu1 %vm146_vm1, %v4241_v61  ;;  %3602 = vmatpush3.msra.mxu0 %v2012_v5 }
 0xc14   :  { %3606 = vmatprep.subr.mxu0 %v4282_v6 }
 0xc15   :  { %3616 = vmatpush3.xpose.msk.msra.mxu1 %vm146_vm1, %v4241_v61 }
 0xc16   :  { %3634 = vmatprep.subr.mxu1 %v2472_v35 }
 0xc18   :  { %3618 = vmatmul.mubr.msk.f32.vlgmr.msra.gmra.mxu1 %vm146_vm1, %v2177_v7 }
 0xc19   :  { %3635 = vmatpush3.msra.mxu1 %v2472_v35 }
 0xc1a   :  { %3636 = vmatprep.subr.mxu1 %v2471_v34 }
 0xc1b   :  { %3637 = vmatpush3.msra.mxu1 %v2471_v34 }
 0xcd0   :  { %v3591_v8 = vpop.f32.mrf.mxu0  ;;  %v3598_v9 = vpop.f32.mrf.mxu1 }
 0xcd1   :  { %v1987_v10 = vadd.f32 %v3598_v9, %v4028_v58  ;;  %v1880_v12 = vadd.f32 %v3591_v8, %v4028_v58 }
 0xcd2   :  { %v1874_v11 = vpop.f32.mrf.mxu0  ;;  %v1981_v51 = vpop.f32.mrf.mxu1 }
 0xcd3   :  { %v1982_v41 = vadd.f32 %v1981_v51, %v4023_v57  ;;  %v1993_v45 = vsel %vm45_vm0, %v1987_v10, -inf  ;;  %v1875_v32 = vadd.f32 %v1874_v11, %v4023_v57  ;;  %v1886_v46 = vsel %vm45_vm0, %v1880_v12, -inf }
 0xcd4   :  { %1994 = vmax.xlane.f32.xlu1 %v1993_v45 }
 0xcd5   :  { %v1990_v50 = vsel %vm45_vm0, %v1982_v41, -inf  ;;  %v1883_v13 = vsel %vm45_vm0, %v1875_v32, -inf }
 0xcd6   :  { %1991 = vmax.xlane.f32.xlu0 %v1990_v50 }
 0xcd8   :  { %v3619_v21 = vpop.f32.mrf.mxu1  ;;  %1887 = vmax.xlane.f32.xlu1 %v1886_v46 }
 0xcd9   :  { %v2256_v20 = vadd.f32 %v3619_v21, %v4028_v58 }
 0xcda   :  { %v2250_v14 = vpop.f32.mrf.mxu1  ;;  %1884 = vmax.xlane.f32.xlu0 %v1883_v13 }
 0xcdb   :  { %v2251_v15 = vadd.f32 %v2250_v14, %v4023_v57  ;;  %v2262_v16 = vsel %vm45_vm0, %v2256_v20, -inf }
 0xcdc   :  { %2263 = vmax.xlane.f32.xlu1 %v2262_v16 }
 0xcdd   :  { %v2259_v28 = vsel %vm45_vm0, %v2251_v15, -inf }
 0xcde   :  { %2260 = vmax.xlane.f32.xlu0 %v2259_v28 }
 0xd5d   :  { %v1995_v17 = vpop.xlane.xlu1 %1994 }
 0xd5e   :  { %v1997_v18 = vsub.f32 %v1987_v10, %v1995_v17 }
 0xd5f   :  { %v1992_v19 = vpop.xlane.xlu0 %1991 }
 0xd60   :  { %v2000_v22 = vmul.f32 1.442695, %v1997_v18  ;;  %v1996_v23 = vsub.f32 %v1982_v41, %v1992_v19 }
 0xd61   :  { %v1888_v24 = vpop.xlane.xlu1 %1887 }
 0xd62   :  { %3748 = vpow2.f32 %v2000_v22  ;;  %v1998_v58 = vmul.f32 1.442695, %v1996_v23  ;;  %v1890_v33 = vsub.f32 %v1880_v12, %v1888_v24  ;;  %v3788_v12 = vld [vmem:[%s4514_s4 + $0x18] ss:$0 sm:$0xff] }
 0xd63   :  { %v1885_v36 = vpop.xlane.xlu0 %1884  ;;  %v1905_v41 = vmul.f32 %v3788_v12, %v4257_v0 }
 0xd64   :  { %3750 = vpow2.f32 %v1998_v58  ;;  %v1893_v25 = vmul.f32 1.442695, %v1890_v33  ;;  %v1889_v26 = vsub.f32 %v1875_v32, %v1885_v36  ;;  %v3789_v32 = vld [vmem:[%s4514_s4 + $0x1a] ss:$0 sm:$0xff]  ;;  %v3791_v33 = vld [vmem:[%s4512_s2 + $0x8] sm:$0xff] }
 0xd65   :  { %v2264_v57 = vpop.xlane.xlu1 %2263  ;;  %v2282_v50 = vmul.f32 %v3789_v32, %v4239_v60  ;;  %v2281_v13 = vmul.f32 %v3789_v32, %v4257_v0  ;;  %v3790_v60 = vld [vmem:[%s4514_s4 + $0x1b] ss:$0 sm:$0xff] }
 0xd66   :  { %3752 = vpow2.f32 %v1893_v25  ;;  %v1891_v27 = vmul.f32 1.442695, %v1889_v26  ;;  %v2266_v29 = vsub.f32 %v2256_v20, %v2264_v57  ;;  %v2367_v0 = vmul.f32 %v3790_v60, %v4251_v63  ;;  %v3792_v63 = vld [vmem:[%s4512_s2] sm:$0xff] }
 0xd67   :  { %v2261_v30 = vpop.xlane.xlu0 %2260 }
 0xd68   :  { %3754 = vpow2.f32 %v1891_v27  ;;  %v2269_v38 = vmul.f32 1.442695, %v2266_v29  ;;  %v2265_v39 = vsub.f32 %v2251_v15, %v2261_v30  ;;  %v2366_v15 = vmul.f32 %v3790_v60, %v4223_v47 }
 0xd6a   :  { %3756 = vpow2.f32 %v2269_v38  ;;  %v2267_v40 = vmul.f32 1.442695, %v2265_v39 }
 0xd6c   :  { %3758 = vpow2.f32 %v2267_v40 }
 0xd6f   :  { %v3749_v42 = vpop.eup %3748 }
 0xd70   :  { %v2005_v43 = vsel %vm45_vm0, %v3749_v42, 0.0 }
 0xd71   :  { %v3751_v44 = vpop.eup %3750  ;;  %2006 = vadd.xlane.f32.xlu1 %v2005_v43 }
 0xd72   :  { %v2002_v48 = vsel %vm45_vm0, %v3751_v44, 0.0 }
 0xd73   :  { %v3753_v49 = vpop.eup %3752  ;;  %2003 = vadd.xlane.f32.xlu0 %v2002_v48 }
 0xd74   :  { %v1898_v52 = vsel %vm45_vm0, %v3753_v49, 0.0 }
 0xd75   :  { %v3755_v53 = vpop.eup %3754  ;;  %1899 = vadd.xlane.f32.xlu1 %v1898_v52 }
 0xd76   :  { %v1895_v54 = vsel %vm45_vm0, %v3755_v53, 0.0 }
 0xd77   :  { %v3757_v55 = vpop.eup %3756  ;;  %1896 = vadd.xlane.f32.xlu0 %v1895_v54 }
 0xd78   :  { %v2274_v59 = vsel %vm45_vm0, %v3757_v55, 0.0 }
 0xd79   :  { %v3759_v62 = vpop.eup %3758  ;;  %2275 = vadd.xlane.f32.xlu1 %v2274_v59 }
 0xd7a   :  { %v2271_v1 = vsel %vm45_vm0, %v3759_v62, 0.0 }
 0xd7b   :  { %2272 = vadd.xlane.f32.xlu0 %v2271_v1  ;;  %v2558_v1 = vld [vmem:[%s4513_s3 + $0x160] sm:$0xff] }
 0xdfa   :  { %v2007_v2 = vpop.xlane.xlu1 %2006 }
 0xdfb   :  { %3760 = vrcp.f32 %v2007_v2  ;;  %v2557_v2 = vld [vmem:[%s4513_s3 + $0x158] sm:$0xff] }
 0xdfc   :  { %v2004_v3 = vpop.xlane.xlu0 %2003 }
 0xdfd   :  { %3762 = vrcp.f32 %v2004_v3  ;;  %v2556_v3 = vld [vmem:[%s4513_s3 + $0x150] sm:$0xff] }
 0xdfe   :  { %v1900_v4 = vpop.xlane.xlu1 %1899 }
 0xdff   :  { %3764 = vrcp.f32 %v1900_v4 }
 0xe00   :  { %v1897_v5 = vpop.xlane.xlu0 %1896 }
 0xe01   :  { %3766 = vrcp.f32 %v1897_v5 }
 0xe02   :  { %v2276_v35 = vpop.xlane.xlu1 %2275 }
 0xe03   :  { %3768 = vrcp.f32 %v2276_v35 }
 0xe04   :  { %v2273_v7 = vpop.xlane.xlu0 %2272 }
 0xe05   :  { %3770 = vrcp.f32 %v2273_v7 }
 0xe08   :  { %v3761_v34 = vpop.eup %3760 }
 0xe09   :  { %v2011_v10 = vmul.f32 %v3761_v34, %v3749_v42  ;;  %v3238_v34 = vld [vmem:[%s4514_s4 + $0xe] ss:$0 sm:$0xff] }
 0xe0a   :  { %v3763_v8 = vpop.eup %3762 }
 0xe0b   :  { %v2009_v9 = vmul.f32 %v3763_v8, %v3751_v44 }
 0xe0c   :  { %v3765_v11 = vpop.eup %3764 }
 0xe0d   :  { %3603 = vmatprep.mubr.msk.f32.mxu0 %vm45_vm0, %v2009_v9  ;;  %v1904_v46 = vmul.f32 %v3765_v11, %v3753_v49  ;;  %v2559_v49 = vld [vmem:[%s4513_s3 + $0x168] sm:$0xff] }
 0xe0e   :  { %v3767_v51 = vpop.eup %3766  ;;  %3604 = vmatmul.mubr.msk.f32.vlgmr.msra.gmra.mxu0 %vm45_vm0, %v2011_v10  ;;  %3641 = vmatprep.subr.mxu1 %v2559_v49 }
 0xe0f   :  { %3607 = vmatpush3.msra.mxu0 %v4282_v6  ;;  %v1902_v45 = vmul.f32 %v3767_v51, %v3755_v53 }
 0xe10   :  { %3608 = vmatprep.subr.mxu0 %v1905_v41  ;;  %v3769_v21 = vpop.eup %3768 }
 0xe11   :  { %3609 = vmatpush3.msra.mxu0 %v1905_v41  ;;  %3610 = vmatprep.mubr.msk.f32.mxu0 %vm45_vm0, %v1902_v45  ;;  %v2280_v14 = vmul.f32 %v3769_v21, %v3757_v55 }
 0xe12   :  { %v3771_v20 = vpop.eup %3770  ;;  %3620 = vmatprep.subr.mxu0 %v2282_v50  ;;  %3611 = vmatmul.mubr.msk.f32.vlgmr.msra.gmra.mxu0 %vm45_vm0, %v1904_v46 }
 0xe13   :  { %3621 = vmatpush3.msra.mxu0 %v2282_v50  ;;  %v2278_v6 = vmul.f32 %v3771_v20, %v3759_v62 }
 0xe14   :  { %3622 = vmatprep.subr.mxu0 %v2281_v13 }
 0xe15   :  { %3623 = vmatpush3.msra.mxu0 %v2281_v13  ;;  %3624 = vmatprep.mubr.msk.f32.mxu0 %vm45_vm0, %v2278_v6 }
 0xe16   :  { %3627 = vmatprep.subr.msk.mxu0 %vm146_vm1, %v4237_v56  ;;  %3625 = vmatmul.mubr.msk.f32.vlgmr.msra.gmra.mxu0 %vm45_vm0, %v2280_v14 }
 0xe17   :  { %3628 = vmatpush3.xpose.msk.msra.mxu0 %vm146_vm1, %v4237_v56  ;;  %3631 = vmatprep.mubr.msk.f32.mxu0 %vm146_vm1, %v2366_v15  ;;  %v2690_v15 = vld [vmem:[%s4513_s3 + $0x180] sm:$0xff] }
 0xe18   :  { %3629 = vmatprep.subr.msk.mxu0 %vm146_vm1, %v4241_v61 }
 0xe1b   :  { %3630 = vmatpush3.xpose.msk.msra.mxu0 %vm146_vm1, %v4241_v61 }
 0xe1e   :  { %3632 = vmatmul.mubr.msk.f32.vlgmr.msra.gmra.mxu0 %vm146_vm1, %v2367_v0  ;;  %v2689_v0 = vld [vmem:[%s4513_s3 + $0x178] sm:$0xff] }
 0xece   :  { %v3605_v47 = vpop.f32.mrf.mxu0 }
 0xed0   :  { %v2086_v16 = vpop.f32.mrf.mxu0 }
 0xed2   :  { %v3612_v28 = vpop.f32.mrf.mxu0 }
 0xed3   :  { %v2173_v17 = vadd.f32 %v3612_v28, %v3605_v47  ;;  %v2688_v47 = vld [vmem:[%s4513_s3 + $0x170] sm:$0xff]  ;;  %v2786_v28 = vld [vmem:[%s4513_s3 + $0x1c0] sm:$0xff] }
 0xed4   :  { %v2167_v18 = vpop.f32.mrf.mxu0 }
 0xed5   :  { %v2168_v19 = vadd.f32 %v2167_v18, %v2086_v16  ;;  %v2787_v16 = vld [vmem:[%s4513_s3 + $0x1c8] sm:$0xff]  ;;  %v2784_v18 = vld [vmem:[%s4513_s3 + $0x1b0] sm:$0xff] }
 0xed6   :  { %v3626_v22 = vpop.f32.mrf.mxu0 }
 0xed7   :  { %v2365_v56 = vadd.f32 %v3626_v22, %v2173_v17  ;;  %v2785_v17 = vld [vmem:[%s4513_s3 + $0x1b8] sm:$0xff] }
 0xed8   :  { %v2355_v23 = vpop.f32.mrf.mxu0 }
 0xed9   :  { %v2364_v24 = vadd.f32 %v2355_v23, %v2168_v19 }
 0xede   :  { %v3633_v58 = vpop.f32.mrf.mxu0 }
 0xedf   :  { %v2446_v61 = vadd.f32 %v3791_v33, %v3633_v58 }
 0xee0   :  { %v2440_v36 = vpop.f32.mrf.mxu0 }
 0xee1   :  { %v2441_v25 = vadd.f32 %v3792_v63, %v2440_v36  ;;  %v2452_v26 = vsel %vm45_vm0, %v2446_v61, -inf }
 0xee2   :  { %2453 = vmax.xlane.f32.xlu1 %v2452_v26 }
 0xee3   :  { %v2449_v57 = vsel %vm45_vm0, %v2441_v25, -inf }
 0xee4   :  { %2450 = vmax.xlane.f32.xlu0 %v2449_v57  ;;  %v3242_v57 = vld [vmem:[%s4514_s4 + $0x12] ss:$0 sm:$0xff] }
 0xf6b   :  { %v2454_v27 = vpop.xlane.xlu1 %2453 }
 0xf6c   :  { %v2456_v29 = vsub.f32 %v2446_v61, %v2454_v27  ;;  %v3241_v61 = vld [vmem:[%s4514_s4 + $0x11] ss:$0 sm:$0xff] }
 0xf6d   :  { %v2451_v30 = vpop.xlane.xlu0 %2450 }
 0xf6e   :  { %v2459_v38 = vmul.f32 1.442695, %v2456_v29  ;;  %v2455_v39 = vsub.f32 %v2441_v25, %v2451_v30 }
 0xf70   :  { %3772 = vpow2.f32 %v2459_v38  ;;  %v2457_v40 = vmul.f32 1.442695, %v2455_v39  ;;  %v2783_v38 = vld [vmem:[%s4513_s3 + $0x1a8] sm:$0xff]  ;;  %v2782_v39 = vld [vmem:[%s4513_s3 + $0x1a0] sm:$0xff] }
 0xf72   :  { %3774 = vpow2.f32 %v2457_v40  ;;  %v2781_v40 = vld [vmem:[%s4513_s3 + $0x198] sm:$0xff] }
 0xf7d   :  { %v3773_v42 = vpop.eup %3772 }
 0xf7e   :  { %v2464_v43 = vsel %vm45_vm0, %v3773_v42, 0.0 }
 0xf7f   :  { %v3775_v44 = vpop.eup %3774  ;;  %2465 = vadd.xlane.f32.xlu1 %v2464_v43  ;;  %v3243_v43 = vld [vmem:[%s4514_s4 + $0xf] ss:$0 sm:$0xff] }
 0xf80   :  { %v2461_v48 = vsel %vm45_vm0, %v3775_v44, 0.0 }
 0xf81   :  { %2462 = vadd.xlane.f32.xlu0 %v2461_v48 }
0x1008   :  { %v2466_v52 = vpop.xlane.xlu1 %2465 }
0x1009   :  { %3776 = vrcp.f32 %v2466_v52 }
0x100a   :  { %v2463_v53 = vpop.xlane.xlu0 %2462 }
0x100b   :  { %3778 = vrcp.f32 %v2463_v53 }
0x1016   :  { %v3777_v54 = vpop.eup %3776 }
0x1017   :  { %v2470_v62 = vmul.f32 %v3777_v54, %v3773_v42  ;;  %v2780_v42 = vld [vmem:[%s4513_s3 + $0x190] sm:$0xff] }
0x1018   :  { %v3779_v55 = vpop.eup %3778 }
0x1019   :  { %v2468_v59 = vmul.f32 %v3779_v55, %v3775_v44  ;;  %v3246_v55 = vld [vmem:[%s4514_s4 + $0x10] ss:$0 sm:$0xff] }
0x101b   :  { %3638 = vmatprep.mubr.msk.f32.mxu1 %vm45_vm0, %v2468_v59 }
0x101c   :  { %3639 = vmatmul.mubr.msk.f32.vlgmr.msra.gmra.mxu1 %vm45_vm0, %v2470_v62 }
0x101d   :  { %3642 = vmatpush3.msra.mxu1 %v2559_v49 }
0x101e   :  { %3643 = vmatprep.subr.mxu1 %v2558_v1 }
0x101f   :  { %3644 = vmatpush3.msra.mxu1 %v2558_v1 }
0x1020   :  { %3645 = vmatprep.subr.mxu1 %v2557_v2 }
0x1021   :  { %3646 = vmatpush3.msra.mxu1 %v2557_v2 }
0x1022   :  { %3647 = vmatprep.subr.mxu1 %v2556_v3 }
0x1023   :  { %3648 = vmatpush3.msra.mxu1 %v2556_v3 }
0x1024   :  { %3663 = vmatprep.subr.mxu1 %v2787_v16 }
0x10dc   :  { %v3640_v4 = vpop.f32.mrf.mxu1 }
0x10dd   :  { %v2555_v7 = vadd.f32 %v3640_v4, %v2365_v56 }
0x10de   :  { %v2545_v5 = vpop.f32.mrf.mxu1 }
0x10df   :  { %v2554_v35 = vadd.f32 %v2545_v5, %v2364_v24 }
0x10e1   :  { %3649 = vmatprep.mubr.msk.f32.mxu1 %vm146_vm1, %v2554_v35 }
0x10e2   :  { %3650 = vmatmul.mubr.msk.f32.vlgmr.msra.gmra.mxu1 %vm146_vm1, %v2555_v7 }
0x10e3   :  { %3664 = vmatpush3.msra.mxu1 %v2787_v16 }
0x10e4   :  { %3665 = vmatprep.subr.mxu1 %v2786_v28 }
0x10e5   :  { %3666 = vmatpush3.msra.mxu1 %v2786_v28  ;;  %v3250_v28 = vld [vmem:[%s4514_s4 + $0x14] ss:$0 sm:$0xff] }
0x10e6   :  { %3667 = vmatprep.subr.mxu1 %v2785_v17 }
0x10e7   :  { %3668 = vmatpush3.msra.mxu1 %v2785_v17 }
0x10e8   :  { %3669 = vmatprep.subr.mxu1 %v2784_v18 }
0x10e9   :  { %3670 = vmatpush3.msra.mxu1 %v2784_v18 }
0x10ea   :  { %3671 = vmatprep.subr.mxu1 %v2783_v38 }
0x10eb   :  { %3672 = vmatpush3.msra.mxu1 %v2783_v38  ;;  %v3043_v38 = vstv %s3042_s10 }
0x10ec   :  { %3673 = vmatprep.subr.mxu1 %v2782_v39 }
0x10ed   :  { %3674 = vmatpush3.msra.mxu1 %v2782_v39  ;;  %v3046_v39 = vstv %s3045_s12 }
0x10ee   :  { %3675 = vmatprep.subr.mxu1 %v2781_v40 }
0x10ef   :  { %3676 = vmatpush3.msra.mxu1 %v2781_v40 }
0x10f0   :  { %3677 = vmatprep.subr.mxu1 %v2780_v42 }
0x10f1   :  { %3678 = vmatpush3.msra.mxu1 %v2780_v42 }
0x11a2   :  { %v3651_v8 = vpop.f32.mrf.mxu1 }
0x11a3   :  { %v2643_v9 = vadd.f32 %v3651_v8, %v3238_v34 }
0x11a4   :  { %v2637_v10 = vpop.f32.mrf.mxu1 }
0x11a5   :  { %v2638_v11 = vadd.f32 %v3238_v34, %v2637_v10  ;;  %v2647_v51 = vadd.f32 %v2643_v9, %v4197_v37 }
0x11a7   :  { %v2653_v12 = vsel %vm146_vm1, %v2647_v51, 0.0  ;;  %v2646_v41 = vadd.f32 %v2638_v11, %v4195_v31  ;;  %v2691_v31 = vld [vmem:[%s4513_s3 + $0x188] sm:$0xff] }
0x11a8   :  { %2654 = vadd.xlane.f32.xlu1 %v2653_v12  ;;  %3652 = vmatprep.subr.mxu0 %v2691_v31 }
0x11a9   :  { %v2650_v45 = vsel %vm146_vm1, %v2646_v41, 0.0  ;;  %3653 = vmatpush3.msra.mxu0 %v2691_v31 }
0x11aa   :  { %2651 = vadd.xlane.f32.xlu0 %v2650_v45  ;;  %3654 = vmatprep.subr.mxu0 %v2690_v15 }
0x11ab   :  { %3655 = vmatpush3.msra.mxu0 %v2690_v15 }
0x11ac   :  { %3656 = vmatprep.subr.mxu0 %v2689_v0 }
0x11ad   :  { %3657 = vmatpush3.msra.mxu0 %v2689_v0  ;;  %v3249_v0 = vld [vmem:[%s4514_s4 + $0x13] ss:$0 sm:$0xff] }
0x11ae   :  { %3658 = vmatprep.subr.mxu0 %v2688_v47 }
0x11af   :  { %3659 = vmatpush3.msra.mxu0 %v2688_v47 }
0x1231   :  { %v2655_v32 = vpop.xlane.xlu1 %2654 }
0x1232   :  { %v2657_v50 = vmul.f32 0.03125, %v2655_v32  ;;  %v2940_v32 = vld [vmem:[%s4513_s3 + $0x208] sm:$0xff] }
0x1233   :  { %v2652_v46 = vpop.xlane.xlu0 %2651 }
0x1234   :  { %v2659_v21 = vsub.f32 %v2647_v51, %v2657_v50  ;;  %v2656_v20 = vmul.f32 0.03125, %v2652_v46  ;;  %v3808_v50 = vmov 0.0   ;;  %v2939_v46 = vld [vmem:[%s4513_s3 + $0x200] sm:$0xff] }
0x1235   :  { %3682 = vmatprep.subr.mxu0 %v3808_v50  ;;  %3135 = vst [vmem:[%s4516_s6] sm:$0x3] %v3808_v50 }
0x1236   :  { %v2658_v13 = vsub.f32 %v2646_v41, %v2656_v20  ;;  %v2661_v6 = vmul.f32 %v2659_v21, %v2659_v21  ;;  %v2937_v20 = vld [vmem:[%s4513_s3 + $0x1f0] sm:$0xff] }
0x1238   :  { %v2665_v14 = vsel %vm146_vm1, %v2661_v6, 0.0  ;;  %v2660_v60 = vmul.f32 %v2658_v13, %v2658_v13 }
0x1239   :  { %2666 = vadd.xlane.f32.xlu1 %v2665_v14 }
0x123a   :  { %v2662_v37 = vsel %vm146_vm1, %v2660_v60, 0.0 }
0x123b   :  { %2663 = vadd.xlane.f32.xlu0 %v2662_v37 }
0x12c2   :  { %v2667_v19 = vpop.xlane.xlu1 %2666 }
0x12c3   :  { %v2669_v22 = vmul.f32 0.03125, %v2667_v19 }
0x12c4   :  { %v2664_v56 = vpop.xlane.xlu0 %2663 }
0x12c5   :  { %v2671_v23 = vadd.f32 1e-05, %v2669_v22  ;;  %v2668_v24 = vmul.f32 0.03125, %v2664_v56 }
0x12c7   :  { %3780 = vrsqrt.f32 %v2671_v23  ;;  %v2670_v58 = vadd.f32 1e-05, %v2668_v24 }
0x12c9   :  { %3782 = vrsqrt.f32 %v2670_v58 }
0x12d4   :  { %v3781_v33 = vpop.eup %3780 }
0x12d5   :  { %v2675_v36 = vmul.f32 %v3781_v33, %v2659_v21  ;;  %v2938_v21 = vld [vmem:[%s4513_s3 + $0x1f8] sm:$0xff] }
0x12d6   :  { %v3783_v63 = vpop.eup %3782 }
0x12d7   :  { %v2674_v25 = vmul.f32 %v3783_v63, %v2658_v13  ;;  %v2681_v26 = vmul.f32 %v3241_v61, %v2675_v36 }
0x12d9   :  { %v2680_v27 = vmul.f32 %v3241_v61, %v2674_v25  ;;  %v2687_v30 = vadd.f32 %v3242_v57, %v2681_v26 }
0x12db   :  { %v2686_v29 = vadd.f32 %v3242_v57, %v2680_v27 }
0x12dd   :  { %3660 = vmatprep.mubr.msk.f32.mxu0 %vm146_vm1, %v2686_v29 }
0x12de   :  { %3661 = vmatmul.mubr.msk.f32.vlgmr.msra.gmra.mxu0 %vm146_vm1, %v2687_v30 }
0x12df   :  { %3690 = vmatprep.mubr.msk.f32.mxu0 %vm3809_vm3, %v3808_v50  ;;  %3683 = vmatpush3.msra.mxu0 %v2940_v32 }
0x12e0   :  { %3684 = vmatprep.subr.mxu0 %v3808_v50 }
0x12e1   :  { %3685 = vmatpush3.msra.mxu0 %v2939_v46 }
0x12e2   :  { %3686 = vmatprep.subr.mxu0 %v3808_v50 }
0x12e3   :  { %3687 = vmatpush3.msra.mxu0 %v2938_v21 }
0x12e4   :  { %3688 = vmatprep.subr.mxu0 %v3808_v50 }
0x12e5   :  { %3689 = vmatpush3.msra.mxu0 %v2937_v20 }
0x12e6   :  { %3693 = vmatprep.subr.mxu0 %v3808_v50 }
0x139e   :  { %v3662_v44 = vpop.f32.mrf.mxu0 }
0x139f   :  { %v2775_v48 = vadd.f32 %v3662_v44, %v3243_v43 }
0x13a0   :  { %v2769_v49 = vpop.f32.mrf.mxu0 }
0x13a1   :  { %v2770_v52 = vadd.f32 %v3243_v43, %v2769_v49  ;;  %v2779_v54 = vmax.f32 %v2775_v48, 0.0 }
0x13a3   :  { %v2778_v53 = vmax.f32 %v2770_v52, 0.0 }
0x13a5   :  { %3679 = vmatprep.mubr.msk.f32.mxu1 %vm1412_vm2, %v2778_v53  ;;  %v3056_v53 = vld [vmem:[%s4513_s3 + $0x1e8] sm:$0xff] }
0x13a6   :  { %3680 = vmatmul.mubr.msk.f32.vlgmr.msra.gmra.mxu1 %vm1412_vm2, %v2779_v54 }
0x1466   :  { %v3681_v59 = vpop.f32.mrf.mxu1 }
0x1467   :  { %v2871_v62 = vadd.f32 %v3681_v59, %v3246_v55  ;;  %v3031_v59 = vstv %s3030_s0 }
0x1468   :  { %v2865_v1 = vpop.f32.mrf.mxu1 }
0x1469   :  { %v2866_v2 = vadd.f32 %v3246_v55, %v2865_v1  ;;  %v2875_v3 = vadd.f32 %v2871_v62, %v2687_v30  ;;  %v3028_v55 = vstv %s3027_s13 }
0x146b   :  { %v2881_v4 = vsel %vm146_vm1, %v2875_v3, 0.0  ;;  %v2874_v5 = vadd.f32 %v2866_v2, %v2686_v29  ;;  %v3019_v29 = vld [vmem:[%s4514_s4 + $0x17] sm:$0x1]  ;;  %v3055_v2 = vld [vmem:[%s4513_s3 + $0x1e0] sm:$0xff] }
0x146c   :  { %2882 = vadd.xlane.f32.xlu1 %v2881_v4  ;;  %v3047_v48 = vmul.f32 %v3046_v39, %v3019_v29  ;;  %v3032_v4 = vmul.f32 %v3031_v59, %v3019_v29 }
0x146d   :  { %v2878_v35 = vsel %vm146_vm1, %v2874_v5, 0.0 }
0x146e   :  { %2879 = vadd.xlane.f32.xlu0 %v2878_v35 }
0x14f5   :  { %v2883_v7 = vpop.xlane.xlu1 %2882 }
0x14f6   :  { %v2885_v34 = vmul.f32 0.03125, %v2883_v7  ;;  %v3053_v7 = vld [vmem:[%s4513_s3 + $0x1d0] sm:$0xff] }
0x14f7   :  { %v2880_v8 = vpop.xlane.xlu0 %2879 }
0x14f8   :  { %v2887_v9 = vsub.f32 %v2875_v3, %v2885_v34  ;;  %v2884_v10 = vmul.f32 0.03125, %v2880_v8 }
0x14fa   :  { %v2886_v11 = vsub.f32 %v2874_v5, %v2884_v10  ;;  %v2889_v51 = vmul.f32 %v2887_v9, %v2887_v9  ;;  %v3054_v5 = vld [vmem:[%s4513_s3 + $0x1d8] sm:$0xff] }
0x14fc   :  { %v2893_v12 = vsel %vm146_vm1, %v2889_v51, 0.0  ;;  %v2888_v41 = vmul.f32 %v2886_v11, %v2886_v11 }
0x14fd   :  { %2894 = vadd.xlane.f32.xlu1 %v2893_v12  ;;  %v3255_v12 = vld [vmem:[%s4514_s4 + $0x15] ss:$0 sm:$0xff] }
0x14fe   :  { %v2890_v45 = vsel %vm146_vm1, %v2888_v41, 0.0 }
0x14ff   :  { %2891 = vadd.xlane.f32.xlu0 %v2890_v45 }
0x1586   :  { %v2895_v13 = vpop.xlane.xlu1 %2894 }
0x1587   :  { %v2897_v6 = vmul.f32 0.03125, %v2895_v13 }
0x1588   :  { %v2892_v14 = vpop.xlane.xlu0 %2891 }
0x1589   :  { %v2899_v60 = vadd.f32 1e-05, %v2897_v6  ;;  %v2896_v37 = vmul.f32 0.03125, %v2892_v14 }
0x158b   :  { %3784 = vrsqrt.f32 %v2899_v60  ;;  %v2898_v31 = vadd.f32 1e-05, %v2896_v37 }
0x158d   :  { %3786 = vrsqrt.f32 %v2898_v31 }
0x1598   :  { %v3785_v15 = vpop.eup %3784 }
0x1599   :  { %v2903_v47 = vmul.f32 %v3785_v15, %v2887_v9  ;;  %v3251_v9 = vld [vmem:[%s4514_s4 + $0x16] ss:$0 sm:$0xff] }
0x159a   :  { %v3787_v16 = vpop.eup %3786 }
0x159b   :  { %v2909_v17 = vmul.f32 %v3249_v0, %v2903_v47  ;;  %v2902_v18 = vmul.f32 %v3787_v16, %v2886_v11 }
0x159d   :  { %v2908_v19 = vmul.f32 %v3249_v0, %v2902_v18  ;;  %v2915_v22 = vadd.f32 %v3250_v28, %v2909_v17 }
0x159f   :  { %v2914_v56 = vadd.f32 %v3250_v28, %v2908_v19  ;;  %2917 = vst.msk [vmem:[#allocation2 + $0x8] sm:$0xff] %vm146_vm1, %v2915_v22  ;;  %v2927_v23 = vsel %vm146_vm1, %v2915_v22, 0.0 }
0x15a0   :  { %v2928_v24 = vrot.slane %v2927_v23, 4 }
0x15a1   :  { %2916 = vst.msk [vmem:[#allocation2] sm:$0xff] %vm146_vm1, %v2914_v56  ;;  %v2918_v58 = vsel %vm146_vm1, %v2914_v56, 0.0 }
0x15a2   :  { %v2919_v33 = vrot.slane %v2918_v58, 4  ;;  %v2929_v61 = vadd.f32 %v2928_v24, %v2927_v23 }
0x15a4   :  { %v2920_v36 = vadd.f32 %v2919_v33, %v2918_v58  ;;  %v2930_v63 = vrot.slane %v2929_v61, 2 }
0x15a6   :  { %v2921_v25 = vrot.slane %v2920_v36, 2  ;;  %v2931_v26 = vadd.f32 %v2930_v63, %v2929_v61 }
0x15a8   :  { %v2922_v57 = vadd.f32 %v2921_v25, %v2920_v36  ;;  %v2932_v27 = vrot.slane %v2931_v26, 1  ;;  %v3254_v30 = vld [vmem:[%s3150_s16 + $0x8] sm:$0x1]  ;;  %v3024_v54 = vld [vmem:[%s3023_s19] sm:$0x1] }
0x15a9   :  { %v3044_v44 = vmul.f32 %v3254_v30, %v3043_v38  ;;  %v3029_v3 = vmul.f32 %v3028_v55, %v3024_v54 }
0x15aa   :  { %v2923_v40 = vrot.slane %v2922_v57, 1  ;;  %v2933_v42 = vadd.f32 %v2932_v27, %v2931_v26 }
0x15ab   :  { %v3048_v1 = vadd.f32 %v3047_v48, %v3044_v44  ;;  %v3033_v34 = vadd.f32 %v3032_v4, %v3029_v3 }
0x15ac   :  { %v2924_v43 = vadd.f32 %v2923_v40, %v2922_v57  ;;  %v2934_v52 = vmul.f32 0.125, %v2933_v42 }
0x15ad   :  { %v3050_v35 = vrot.slane %v3048_v1, 7 }
0x15ae   :  { %v2926_v49 = vmul.f32 0.125, %v2924_v43 }
0x15af   :  { %v3052_v8 = vsel %vm2935_vm4, %v3033_v34, %v3050_v35 }
0x15b0   :  { %v2936_v62 = vsel %vm2935_vm4, %v2926_v49, %v2934_v52 }
0x15b1   :  { %3691 = vmatmul.mubr.msk.f32.vlgmr.msra.gmra.mxu0 %vm146_vm1, %v2936_v62 }
0x15b2   :  { %3694 = vmatpush3.msra.mxu0 %v3056_v53  ;;  %3701 = vmatprep.mubr.msk.f32.mxu0 %vm3809_vm3, %v3808_v50 }
0x15b3   :  { %3695 = vmatprep.subr.mxu0 %v3808_v50 }
0x15b4   :  { %3696 = vmatpush3.msra.mxu0 %v3055_v2 }
0x15b5   :  { %3697 = vmatprep.subr.mxu0 %v3808_v50 }
0x15b6   :  { %3698 = vmatpush3.msra.mxu0 %v3054_v5 }
0x15b7   :  { %3699 = vmatprep.subr.mxu0 %v3808_v50 }
0x15b8   :  { %3700 = vmatpush3.msra.mxu0 %v3053_v7 }
0x15b9   :  { %3702 = vmatmul.mubr.msk.f32.vlgmr.msra.gmra.mxu0 %vm146_vm1, %v3052_v8 }
0x1671   :  { %v3015_v10 = vpop.f32.mrf.mxu0 }
0x1672   :  { %v3016_v11 = vadd.f32 %v3251_v9, %v3015_v10 }
0x1673   :  { %v3692_v51 = vpop.f32.mrf.mxu0 }
0x1674   :  { %3137 = vst.msk [vmem:[%s4516_s6] sm:$0x3] %vm3136_vm5, %v3016_v11 }
0x1679   :  { %v3131_v41 = vpop.f32.mrf.mxu0 }
0x167a   :  { %v3132_v45 = vadd.f32 %v3255_v12, %v3131_v41 }
0x167b   :  { %v3703_v32 = vpop.f32.mrf.mxu0 }
0x167c   :  { %3139 = vrot.lane.b32.xlu0 %v3132_v45, %s3810_s30 }
0x16ee   :  { %v3140_v50 = vpop.permute.xlu0 %3139 }
0x16ef   :  { %3143 = vst.msk [vmem:[%s4516_s6] sm:$0x3] %vm3142_vm6, %v3140_v50 }
0x16f0   :  { %3148 = vsyncpa [#allocation4], 1 }

</bundles_post_ra>
